<compile_context>
chip_gen: v6e
topology: v6e:2x2x1
jax: 0.10.0
libtpu: 0.0.40
codegen_flags: <defaults>
</compile_context>

<pallas_src>
import math
from functools import partial

import jax
import jax.numpy as jnp
from jax.experimental import pallas as pl
from jax.experimental.pallas import tpu as pltpu

_MXU_DTYPE = jnp.bfloat16      # MXU operand dtype (accumulation stays f32)
_ACT_DTYPE = jnp.bfloat16      # HBM dtype for intermediate activations
_LN_EPS = 1e-5


def _detect_vmem_limit():
    # Generation-aware scoped-VMEM limit: ~96 MiB on v5e/v6e (128 MiB phys),
    # ~48 MiB on v7x (64 MiB phys).  Falls back to 64 MiB if the query fails.
    try:
        cap = int(pltpu.get_tpu_info().vmem_capacity_bytes)
    except Exception:
        cap = 128 * 1024 * 1024
    return max(32 * 1024 * 1024, (cap // 4) * 3)


_VMEM_LIMIT = _detect_vmem_limit()
_TILE_BUDGET = _VMEM_LIMIT // 2          # leave headroom for compiler scratch


# ----------------------------- in-kernel helpers -----------------------------

def _gelu_tanh(x):
    # tanh-form GELU: tanh runs on the EUP (its own VLIW slot) instead of a
    # ~10-op VALU erf polynomial.
    # TODO(synk): torch.nn.GELU() defaults to the exact erf form; this is the
    # standard tanh approximation (small systematic deviation).
    c = 0.7978845608028654  # sqrt(2/pi)
    return 0.5 * x * (1.0 + jnp.tanh(c * (x + 0.044715 * x * x * x)))


def _layernorm(x, gamma, beta):
    mean = jnp.mean(x, axis=-1, keepdims=True)
    var = jnp.mean((x - mean) ** 2, axis=-1, keepdims=True)   # biased, like torch LN
    return (x - mean) * jax.lax.rsqrt(var + _LN_EPS) * gamma + beta


# ------------------------------- Pallas kernels -------------------------------

def _make_ln_linear_kernel(activation):
    def kernel(x_ref, g_ref, b_ref, w_ref, bias_ref, o_ref):
        xh = _layernorm(x_ref[...], g_ref[...], b_ref[...])          # f32
        y = jnp.dot(xh.astype(_MXU_DTYPE), w_ref[...],
                    preferred_element_type=jnp.float32) + bias_ref[...]
        if activation == "gelu":
            y = _gelu_tanh(y)
        o_ref[...] = y.astype(o_ref.dtype)
    return kernel


def _linear_residual_kernel(x_ref, w_ref, bias_ref, res_ref, o_ref):
    # o = residual + x @ w + bias   (fused residual add; saves one HBM pass)
    y = jnp.dot(x_ref[...].astype(_MXU_DTYPE), w_ref[...],
                preferred_element_type=jnp.float32) + bias_ref[...]
    o_ref[...] = (res_ref[...] + y).astype(o_ref.dtype)


def _performer_attention_kernel(q_ref, k_ref, v_ref, projt_ref, o_ref):
    # q/k/v blocks: (1, N, n_heads_in_block*dh); projt: (dh, m) with
    # dn = dh**-0.25 already folded in; o: (1, N, n_heads_in_block*dh).
    dh = projt_ref.shape[0]
    m = projt_ref.shape[1]
    n_heads = q_ref.shape[2] // dh
    dn2 = float(dh) ** -0.5          # dn^2 (dn itself is folded into projt)
    ratio = float(m) ** -0.5
    eps = 1e-4
    projt = projt_ref[...]           # (dh, m), bf16

    # Static unrolled loop over the heads resident in this block.
    for t in range(n_heads):
        lo, hi = t * dh, (t + 1) * dh
        q = q_ref[0, :, lo:hi]                         # (n, dh) bf16
        k = k_ref[0, :, lo:hi]
        v = v_ref[0, :, lo:hi]
        q_f = q.astype(jnp.float32)
        k_f = k.astype(jnp.float32)

        # Random-feature projections (MXU, bf16 in / f32 accumulate).
        q_dash = jnp.dot(q, projt, preferred_element_type=jnp.float32)   # (n, m)
        k_dash = jnp.dot(k, projt, preferred_element_type=jnp.float32)   # (n, m)

        diag_q = 0.5 * dn2 * jnp.sum(q_f * q_f, axis=-1, keepdims=True)  # (n, 1)
        diag_k = 0.5 * dn2 * jnp.sum(k_f * k_f, axis=-1, keepdims=True)  # (n, 1)

        # softmax kernel: per-row max for queries, per-(batch, head) max for
        # keys (matches the PyTorch reference amax over dims (-1, -2)).
        q_prime = ratio * (jnp.exp(q_dash - diag_q
                                   - jnp.max(q_dash, axis=-1, keepdims=True)) + eps)
        k_prime = ratio * (jnp.exp(k_dash - diag_k - jnp.max(k_dash)) + eps)

        # Linear (non-causal) attention — all contractions on the MXU.
        k_cumsum = jnp.sum(k_prime, axis=0, keepdims=True)               # (1, m)
        d = jnp.sum(q_prime * k_cumsum, axis=-1, keepdims=True)          # (n, 1)
        d_inv = pl.reciprocal(d, approx=True)
        context = jnp.einsum('nm,nd->md', k_prime.astype(_MXU_DTYPE), v,
                             preferred_element_type=jnp.float32)         # (m, dh)
        out = jnp.einsum('nm,md->nd', q_prime.astype(_MXU_DTYPE),
                         context.astype(_MXU_DTYPE),
                         preferred_element_type=jnp.float32)             # (n, dh)
        o_ref[0, :, lo:hi] = (out * d_inv).astype(o_ref.dtype)
    # TODO(synk): for very long N on v7x, additionally tile N inside this kernel
    # (accumulate k_cumsum / context over K tiles, then stream Q tiles).


# ------------------------------ kernel wrappers -------------------------------

def _col_tile(nout):
    # Lane-dense (multiple-of-128) output-column tile, else the full width.
    for t in (2048, 1024, 512, 256, 128):
        if nout % t == 0:
            return t
    return nout


def _row_tile(rows, d, tn, out_bytes, budget):
    # Largest divisor row-tile whose (double-buffered) working set fits budget.
    for t in (1024, 512, 256, 128, 64, 32, 16, 8):
        if rows % t:
            continue
        foot = (2 * t * d * 4            # x block (f32), double-buffered
                + 2 * t * tn * out_bytes # output block, double-buffered
                + 2 * t * tn * 4         # residual block (f32, worst case)
                + 2 * d * tn * 2         # weight block (bf16), double-buffered
                + 2 * tn * 4)            # bias block
        if foot <= budget:
            return t
    # TODO(synk): rows with no divisor of 8 fall back to one full block
    # (correct, but disables double-buffering).
    return rows


def ln_linear(x2d, gamma, beta, w, bias, activation=None, out_dtype=jnp.float32):
    rows, d = x2d.shape
    nout = w.shape[1]
    tn = _col_tile(nout)
    tm = _row_tile(rows, d, tn, jnp.dtype(out_dtype).itemsize, _TILE_BUDGET)
    return pl.pallas_call(
        _make_ln_linear_kernel(activation),
        out_shape=jax.ShapeDtypeStruct((rows, nout), out_dtype),
        grid=(rows // tm, nout // tn),
        in_specs=[
            pl.BlockSpec((tm, d), lambda i, j: (i, 0)),
            pl.BlockSpec((1, d), lambda i, j: (0, 0)),
            pl.BlockSpec((1, d), lambda i, j: (0, 0)),
            pl.BlockSpec((d, tn), lambda i, j: (0, j)),
            pl.BlockSpec((1, tn), lambda i, j: (0, j)),
        ],
        out_specs=pl.BlockSpec((tm, tn), lambda i, j: (i, j)),
        compiler_params=pltpu.CompilerParams(
            dimension_semantics=("parallel", "parallel"),
            vmem_limit_bytes=_VMEM_LIMIT),
    )(x2d, gamma, beta, w, bias)


def linear_residual(x2d, w, bias, residual, out_dtype=jnp.float32):
    rows, d = x2d.shape
    nout = w.shape[1]
    tn = _col_tile(nout)
    tm = _row_tile(rows, d, tn, jnp.dtype(out_dtype).itemsize, _TILE_BUDGET)
    return pl.pallas_call(
        _linear_residual_kernel,
        out_shape=jax.ShapeDtypeStruct((rows, nout), out_dtype),
        grid=(rows // tm, nout // tn),
        in_specs=[
            pl.BlockSpec((tm, d), lambda i, j: (i, 0)),
            pl.BlockSpec((d, tn), lambda i, j: (0, j)),
            pl.BlockSpec((1, tn), lambda i, j: (0, j)),
            pl.BlockSpec((tm, tn), lambda i, j: (i, j)),
        ],
        out_specs=pl.BlockSpec((tm, tn), lambda i, j: (i, j)),
        compiler_params=pltpu.CompilerParams(
            dimension_semantics=("parallel", "parallel"),
            vmem_limit_bytes=_VMEM_LIMIT),
    )(x2d, w, bias, residual)


def _head_group(heads, dim_head):
    # Smallest divisor g of `heads` whose lane width g*dim_head is a multiple
    # of 128 (so the fused-qkv blocks are legal AND lane-dense).  None -> no
    # such group exists (tiny dims); caller falls back to a per-batch block.
    for g in range(1, heads + 1):
        if heads % g == 0 and (g * dim_head) % 128 == 0:
            return g
    return None


def performer_attention(qkv3, proj_t, *, heads, dim_head):
    # qkv3: (B, N, 3*inner) bf16 (fused Q|K|V, heads laid out as 'b n (h d)').
    # Returns (B, N, inner) bf16 with heads already merged ('b n (h d)').
    B, N, _ = qkv3.shape
    inner = heads * dim_head
    m = proj_t.shape[1]
    g = _head_group(heads, dim_head)

    if g is not None:
        ng = heads // g
        blk = g * dim_head
        in_specs = [
            pl.BlockSpec((1, N, blk), lambda b, h: (b, 0, h)),
            pl.BlockSpec((1, N, blk), lambda b, h, ng=ng: (b, 0, ng + h)),
            pl.BlockSpec((1, N, blk), lambda b, h, ng=ng: (b, 0, 2 * ng + h)),
        ]
        args = (qkv3, qkv3, qkv3)
    else:
        # TODO(synk): head-group width < 128 lanes -> split q/k/v via XLA column
        # slices (extra copy) so every Pallas block uses full last dims.
        ng, blk = 1, inner
        q = qkv3[..., :inner]
        k = qkv3[..., inner:2 * inner]
        v = qkv3[..., 2 * inner:]
        in_specs = [pl.BlockSpec((1, N, blk), lambda b, h: (b, 0, 0))] * 3
        args = (q, k, v)

    in_specs = in_specs + [pl.BlockSpec((dim_head, m), lambda b, h: (0, 0))]
    return pl.pallas_call(
        _performer_attention_kernel,
        out_shape=jax.ShapeDtypeStruct((B, N, inner), _ACT_DTYPE),
        grid=(B, ng),
        in_specs=in_specs,
        out_specs=pl.BlockSpec((1, N, blk), lambda b, h: (b, 0, h)),
        compiler_params=pltpu.CompilerParams(
            dimension_semantics=("parallel", "parallel"),
            vmem_limit_bytes=_VMEM_LIMIT),
    )(*args, proj_t)


# ------------------------- parameter setup (plain JAX) -------------------------

def _orthogonal_chunk(key, cols):
    unstructured = jax.random.normal(key, (cols, cols), dtype=jnp.float32)
    q, _ = jnp.linalg.qr(unstructured)
    return q.T


def gaussian_orthogonal_random_matrix(key, nb_rows, nb_cols):
    nb_full_blocks = nb_rows // nb_cols
    keys = jax.random.split(key, nb_full_blocks + 2)
    blocks = [_orthogonal_chunk(keys[i], nb_cols) for i in range(nb_full_blocks)]
    remaining = nb_rows - nb_full_blocks * nb_cols
    if remaining > 0:
        blocks.append(_orthogonal_chunk(keys[nb_full_blocks], nb_cols)[:remaining])
    final = jnp.concatenate(blocks, axis=0)
    multiplier = jnp.linalg.norm(
        jax.random.normal(keys[-1], (nb_rows, nb_cols), dtype=jnp.float32), axis=1)
    return multiplier[:, None] * final


def _init_linear(key, in_dim, out_dim):
    kw, kb = jax.random.split(key)
    w = jax.random.normal(kw, (in_dim, out_dim), jnp.float32) / math.sqrt(in_dim)
    b = 0.02 * jax.random.normal(kb, (1, out_dim), jnp.float32)
    return w.astype(_MXU_DTYPE), b      # weights stored bf16, bias f32


def init_performer_params(key, dim, depth, heads, dim_head, mlp_dim):
    inner = heads * dim_head
    nb_features = int(dim_head * math.log(dim_head))
    dn = float(dim_head) ** -0.25
    layers = []
    for _ in range(depth):
        key, *ks = jax.random.split(key, 6)
        wqkv, bqkv = _init_linear(ks[0], dim, 3 * inner)   # fused Q|K|V projection
        wo, bo = _init_linear(ks[1], inner, dim)
        w1, b1 = _init_linear(ks[2], dim, mlp_dim)
        w2, b2 = _init_linear(ks[3], mlp_dim, dim)
        proj = gaussian_orthogonal_random_matrix(ks[4], nb_features, dim_head)
        layers.append(dict(
            ln1_g=jnp.ones((1, dim), jnp.float32), ln1_b=jnp.zeros((1, dim), jnp.float32),
            ln2_g=jnp.ones((1, dim), jnp.float32), ln2_b=jnp.zeros((1, dim), jnp.float32),
            wqkv=wqkv, bqkv=bqkv, wo=wo, bo=bo, w1=w1, b1=b1, w2=w2, b2=b2,
            # (dim_head, nb_features); dn = dh**-0.25 folded in once at init.
            proj_t=(proj.T * dn).astype(_MXU_DTYPE),
        ))
    return layers


# --------------------------------- forward ------------------------------------

def performer_forward(x, layers, *, heads, dim_head):
    B, N, D = x.shape
    inner = heads * dim_head

    for layer in layers:
        # --- PreNorm(PerformerSelfAttention) + residual (fused) ---
        x2 = x.reshape(B * N, D)
        qkv = ln_linear(x2, layer["ln1_g"], layer["ln1_b"],
                        layer["wqkv"], layer["bqkv"],
                        out_dtype=_ACT_DTYPE)                       # fused LN + QKV
        attn = performer_attention(qkv.reshape(B, N, 3 * inner), layer["proj_t"],
                                   heads=heads, dim_head=dim_head)  # (B, N, inner)
        x = linear_residual(attn.reshape(B * N, inner),
                            layer["wo"], layer["bo"], x2).reshape(B, N, D)

        # --- PreNorm(FeedForward) + residual (fused) ---  (dropout p=0.0 -> identity)
        x2 = x.reshape(B * N, D)
        h1 = ln_linear(x2, layer["ln2_g"], layer["ln2_b"],
                       layer["w1"], layer["b1"],
                       activation="gelu", out_dtype=_ACT_DTYPE)     # fused LN + MLP-up
        x = linear_residual(h1, layer["w2"], layer["b2"], x2).reshape(B, N, D)
    return x


if __name__ == "__main__":
    B, N = 2, 8
    DIM, DEPTH, HEADS, DIM_HEAD, MLP_DIM = 32, 2, 4, 8, 64

    key = jax.random.PRNGKey(0)
    kparam, kx = jax.random.split(key)
    layers = init_performer_params(kparam, DIM, DEPTH, HEADS, DIM_HEAD, MLP_DIM)
    x = jax.random.normal(kx, (B, N, DIM), dtype=jnp.float32)

    fwd = jax.jit(partial(performer_forward, heads=HEADS, dim_head=DIM_HEAD))
    y = fwd(x, layers)
    jax.block_until_ready(y)
    assert y.shape == (B, N, DIM)
    assert bool(jnp.all(jnp.isfinite(y)))
    print("KERNEL_OK")
</pallas_src>

<mosaic_0001>
module attributes {stable_mosaic.version = 11 : i64} {
  func.func @_linear_residual_kernel(%arg0: i32, %arg1: i32, %arg2: memref<16x32xbf16, #tpu.memory_space<vmem>>, %arg3: memref<32x32xbf16, #tpu.memory_space<vmem>>, %arg4: memref<1x32xf32, #tpu.memory_space<vmem>>, %arg5: memref<16x32xf32, #tpu.memory_space<vmem>>, %arg6: memref<16x32xf32, #tpu.memory_space<vmem>>) attributes {dimension_semantics = [#tpu.dimension_semantics<parallel>, #tpu.dimension_semantics<parallel>], iteration_bounds = array<i64: 1, 1>, scalar_prefetch = 0 : i64, scratch_operands = 0 : i64, tpu.core_type = #tpu.core_type<tc>, window_params = [{transform_indices = @transform_0, window_bounds = array<i64: 16, 32>}, {transform_indices = @transform_1, window_bounds = array<i64: 32, 32>}, {transform_indices = @transform_2, window_bounds = array<i64: 1, 32>}, {transform_indices = @transform_3, window_bounds = array<i64: 16, 32>}, {transform_indices = @transform_4, window_bounds = array<i64: 16, 32>}]} {
    %c0 = arith.constant 0 : index
    %c0_0 = arith.constant 0 : index
    %0 = vector.load %arg2[%c0, %c0_0] : memref<16x32xbf16, #tpu.memory_space<vmem>>, vector<16x32xbf16>
    %c0_1 = arith.constant 0 : index
    %c0_2 = arith.constant 0 : index
    %1 = vector.load %arg3[%c0_1, %c0_2] : memref<32x32xbf16, #tpu.memory_space<vmem>>, vector<32x32xbf16>
    %cst = arith.constant dense<0.000000e+00> : vector<16x32xf32>
    %2 = tpu.matmul %0, %1, %cst {dimension_numbers = #tpu.dot_dimension_numbers<[1], [0], [0], [1], [0, 0, 1, 1], [], []>} : vector<16x32xbf16>, vector<32x32xbf16>, vector<16x32xf32> -> vector<16x32xf32>
    %c0_3 = arith.constant 0 : index
    %c0_4 = arith.constant 0 : index
    %3 = vector.load %arg4[%c0_3, %c0_4] : memref<1x32xf32, #tpu.memory_space<vmem>>, vector<1x32xf32>
    %4 = vector.broadcast %3 : vector<1x32xf32> to vector<16x32xf32>
    %5 = arith.addf %2, %4 : vector<16x32xf32>
    %c0_5 = arith.constant 0 : index
    %c0_6 = arith.constant 0 : index
    %6 = vector.load %arg5[%c0_5, %c0_6] : memref<16x32xf32, #tpu.memory_space<vmem>>, vector<16x32xf32>
    %7 = arith.addf %6, %5 : vector<16x32xf32>
    %c0_7 = arith.constant 0 : index
    %c0_8 = arith.constant 0 : index
    %8 = vector.load %arg6[%c0_7, %c0_8] : memref<16x32xf32, #tpu.memory_space<vmem>>, vector<16x32xf32>
    tpu.vector_store %arg6[%c0_7, %c0_8], %7 {strides = array<i32>} : memref<16x32xf32, #tpu.memory_space<vmem>>, vector<16x32xf32>,
    return
  }
  func.func @transform_0(%arg0: i32, %arg1: i32) -> (i32, i32) {
    %c0_i32 = arith.constant 0 : i32
    %c0_i32_0 = arith.constant 0 : i32
    return %arg0, %c0_i32 : i32, i32
  }
  func.func @transform_1(%arg0: i32, %arg1: i32) -> (i32, i32) {
    %c0_i32 = arith.constant 0 : i32
    %c0_i32_0 = arith.constant 0 : i32
    return %c0_i32, %arg1 : i32, i32
  }
  func.func @transform_2(%arg0: i32, %arg1: i32) -> (i32, i32) {
    %c0_i32 = arith.constant 0 : i32
    %c0_i32_0 = arith.constant 0 : i32
    return %c0_i32, %arg1 : i32, i32
  }
  func.func @transform_3(%arg0: i32, %arg1: i32) -> (i32, i32) {
    %c0_i32 = arith.constant 0 : i32
    return %arg0, %arg1 : i32, i32
  }
  func.func @transform_4(%arg0: i32, %arg1: i32) -> (i32, i32) {
    %c0_i32 = arith.constant 0 : i32
    return %arg0, %arg1 : i32, i32
  }
}

module attributes {stable_mosaic.version = 11 : i64} {
  func.func @_performer_attention_kernel(%arg0: i32, %arg1: i32, %arg2: memref<1x8x32xbf16, #tpu.memory_space<vmem>>, %arg3: memref<1x8x32xbf16, #tpu.memory_space<vmem>>, %arg4: memref<1x8x32xbf16, #tpu.memory_space<vmem>>, %arg5: memref<8x16xbf16, #tpu.memory_space<vmem>>, %arg6: memref<1x8x32xbf16, #tpu.memory_space<vmem>>) attributes {dimension_semantics = [#tpu.dimension_semantics<parallel>, #tpu.dimension_semantics<parallel>], iteration_bounds = array<i64: 2, 1>, scalar_prefetch = 0 : i64, scratch_operands = 0 : i64, tpu.core_type = #tpu.core_type<tc>, window_params = [{transform_indices = @transform_0, window_bounds = array<i64: 1, 8, 32>}, {transform_indices = @transform_1, window_bounds = array<i64: 1, 8, 32>}, {transform_indices = @transform_2, window_bounds = array<i64: 1, 8, 32>}, {pipeline_mode = #tpu.pipeline_mode<synchronous>, transform_indices = @transform_3, window_bounds = array<i64: 8, 16>}, {transform_indices = @transform_4, window_bounds = array<i64: 1, 8, 32>}]} {
    %c0 = arith.constant 0 : index
    %c0_0 = arith.constant 0 : index
    %0 = vector.load %arg5[%c0, %c0_0] : memref<8x16xbf16, #tpu.memory_space<vmem>>, vector<8x16xbf16>
    %c0_1 = arith.constant 0 : index
    %c0_2 = arith.constant 0 : index
    %c0_3 = arith.constant 0 : index
    %1 = vector.load %arg2[%c0_1, %c0_2, %c0_3] : memref<1x8x32xbf16, #tpu.memory_space<vmem>>, vector<1x8x8xbf16>
    %2 = vector.shape_cast %1 : vector<1x8x8xbf16> to vector<8x8xbf16>
    %c0_4 = arith.constant 0 : index
    %c0_5 = arith.constant 0 : index
    %c0_6 = arith.constant 0 : index
    %3 = vector.load %arg3[%c0_4, %c0_5, %c0_6] : memref<1x8x32xbf16, #tpu.memory_space<vmem>>, vector<1x8x8xbf16>
    %4 = vector.shape_cast %3 : vector<1x8x8xbf16> to vector<8x8xbf16>
    %c0_7 = arith.constant 0 : index
    %c0_8 = arith.constant 0 : index
    %c0_9 = arith.constant 0 : index
    %5 = vector.load %arg4[%c0_7, %c0_8, %c0_9] : memref<1x8x32xbf16, #tpu.memory_space<vmem>>, vector<1x8x8xbf16>
    %6 = vector.shape_cast %5 : vector<1x8x8xbf16> to vector<8x8xbf16>
    %7 = arith.extf %2 : vector<8x8xbf16> to vector<8x8xf32>
    %8 = arith.extf %4 : vector<8x8xbf16> to vector<8x8xf32>
    %cst = arith.constant dense<0.000000e+00> : vector<8x16xf32>
    %9 = tpu.matmul %2, %0, %cst {dimension_numbers = #tpu.dot_dimension_numbers<[1], [0], [0], [1], [0, 0, 1, 1], [], []>} : vector<8x8xbf16>, vector<8x16xbf16>, vector<8x16xf32> -> vector<8x16xf32>
    %cst_10 = arith.constant dense<0.000000e+00> : vector<8x16xf32>
    %10 = tpu.matmul %4, %0, %cst_10 {dimension_numbers = #tpu.dot_dimension_numbers<[1], [0], [0], [1], [0, 0, 1, 1], [], []>} : vector<8x8xbf16>, vector<8x16xbf16>, vector<8x16xf32> -> vector<8x16xf32>
    %11 = arith.mulf %7, %7 : vector<8x8xf32>
    %cst_11 = arith.constant dense<0.000000e+00> : vector<8xf32>
    %12 = vector.multi_reduction <add>, %11, %cst_11 [1] : vector<8x8xf32> to vector<8xf32>
    %13 = vector.shape_cast %12 : vector<8xf32> to vector<8x1xf32>
    %cst_12 = arith.constant 0.176776692 : f32
    %14 = vector.broadcast %cst_12 : f32 to vector<8x1xf32>
    %15 = arith.mulf %14, %13 : vector<8x1xf32>
    %16 = arith.mulf %8, %8 : vector<8x8xf32>
    %cst_13 = arith.constant dense<0.000000e+00> : vector<8xf32>
    %17 = vector.multi_reduction <add>, %16, %cst_13 [1] : vector<8x8xf32> to vector<8xf32>
    %18 = vector.shape_cast %17 : vector<8xf32> to vector<8x1xf32>
    %cst_14 = arith.constant 0.176776692 : f32
    %19 = vector.broadcast %cst_14 : f32 to vector<8x1xf32>
    %20 = arith.mulf %19, %18 : vector<8x1xf32>
    %21 = vector.broadcast %15 : vector<8x1xf32> to vector<8x16xf32>
    %22 = arith.subf %9, %21 : vector<8x16xf32>
    %cst_15 = arith.constant dense<0xFF800000> : vector<8xf32>
    %23 = vector.multi_reduction <maximumf>, %9, %cst_15 [1] : vector<8x16xf32> to vector<8xf32>
    %24 = vector.shape_cast %23 : vector<8xf32> to vector<8x1xf32>
    %25 = vector.broadcast %24 : vector<8x1xf32> to vector<8x16xf32>
    %26 = arith.subf %22, %25 : vector<8x16xf32>
    %27 = math.exp %26 : vector<8x16xf32>
    %cst_16 = arith.constant 9.99999974E-5 : f32
    %28 = vector.broadcast %cst_16 : f32 to vector<8x16xf32>
    %29 = arith.addf %27, %28 : vector<8x16xf32>
    %cst_17 = arith.constant 2.500000e-01 : f32
    %30 = vector.broadcast %cst_17 : f32 to vector<8x16xf32>
    %31 = arith.mulf %30, %29 : vector<8x16xf32>
    %32 = vector.broadcast %20 : vector<8x1xf32> to vector<8x16xf32>
    %33 = arith.subf %10, %32 : vector<8x16xf32>
    %34 = vector.shape_cast %10 : vector<8x16xf32> to vector<1x8x16xf32>
    %cst_18 = arith.constant dense<0xFF800000> : vector<1xf32>
    %35 = vector.multi_reduction <maximumf>, %34, %cst_18 [1, 2] : vector<1x8x16xf32> to vector<1xf32>
    %36 = vector.shape_cast %35 : vector<1xf32> to vector<1x1x1xf32>
    %37 = vector.extract %36[0, 0, 0] : f32 from vector<1x1x1xf32>
    %38 = vector.broadcast %37 : f32 to vector<8x16xf32>
    %39 = arith.subf %33, %38 : vector<8x16xf32>
    %40 = math.exp %39 : vector<8x16xf32>
    %cst_19 = arith.constant 9.99999974E-5 : f32
    %41 = vector.broadcast %cst_19 : f32 to vector<8x16xf32>
    %42 = arith.addf %40, %41 : vector<8x16xf32>
    %cst_20 = arith.constant 2.500000e-01 : f32
    %43 = vector.broadcast %cst_20 : f32 to vector<8x16xf32>
    %44 = arith.mulf %43, %42 : vector<8x16xf32>
    %cst_21 = arith.constant dense<0.000000e+00> : vector<16xf32>
    %45 = vector.multi_reduction <add>, %44, %cst_21 [0] : vector<8x16xf32> to vector<16xf32>
    %46 = vector.shape_cast %45 : vector<16xf32> to vector<1x16xf32>
    %47 = vector.broadcast %46 : vector<1x16xf32> to vector<8x16xf32>
    %48 = arith.mulf %31, %47 : vector<8x16xf32>
    %cst_22 = arith.constant dense<0.000000e+00> : vector<8xf32>
    %49 = vector.multi_reduction <add>, %48, %cst_22 [1] : vector<8x16xf32> to vector<8xf32>
    %50 = vector.shape_cast %49 : vector<8xf32> to vector<8x1xf32>
    %51 = tpu.reciprocal %50 {approx = true} : vector<8x1xf32> -> vector<8x1xf32>
    %52 = arith.truncf %44 : vector<8x16xf32> to vector<8x16xbf16>
    "tpu.trace_start"() <{level = 10 : i32, message = "nm,nd->md"}> : () -> ()
    %cst_23 = arith.constant dense<0.000000e+00> : vector<16x8xf32>
    %53 = tpu.matmul %52, %6, %cst_23 {dimension_numbers = #tpu.dot_dimension_numbers<[0], [0], [1], [1], [0, 1, 1, 1], [], []>} : vector<8x16xbf16>, vector<8x8xbf16>, vector<16x8xf32> -> vector<16x8xf32>
    "tpu.trace_stop"() : () -> ()
    %54 = arith.truncf %31 : vector<8x16xf32> to vector<8x16xbf16>
    %55 = arith.truncf %53 : vector<16x8xf32> to vector<16x8xbf16>
    "tpu.trace_start"() <{level = 10 : i32, message = "nm,md->nd"}> : () -> ()
    %cst_24 = arith.constant dense<0.000000e+00> : vector<8x8xf32>
    %56 = tpu.matmul %54, %55, %cst_24 {dimension_numbers = #tpu.dot_dimension_numbers<[1], [0], [0], [1], [0, 0, 1, 1], [], []>} : vector<8x16xbf16>, vector<16x8xbf16>, vector<8x8xf32> -> vector<8x8xf32>
    "tpu.trace_stop"() : () -> ()
    %57 = vector.broadcast %51 : vector<8x1xf32> to vector<8x8xf32>
    %58 = arith.mulf %56, %57 : vector<8x8xf32>
    %59 = arith.truncf %58 : vector<8x8xf32> to vector<8x8xbf16>
    %c0_25 = arith.constant 0 : index
    %c0_26 = arith.constant 0 : index
    %c0_27 = arith.constant 0 : index
    %60 = vector.load %arg6[%c0_25, %c0_26, %c0_27] : memref<1x8x32xbf16, #tpu.memory_space<vmem>>, vector<1x8x8xbf16>
    %61 = vector.shape_cast %60 : vector<1x8x8xbf16> to vector<8x8xbf16>
    %62 = vector.shape_cast %59 : vector<8x8xbf16> to vector<1x8x8xbf16>
    tpu.vector_store %arg6[%c0_25, %c0_26, %c0_27], %62 {strides = array<i32>} : memref<1x8x32xbf16, #tpu.memory_space<vmem>>, vector<1x8x8xbf16>,
    %c0_28 = arith.constant 0 : index
    %c0_29 = arith.constant 0 : index
    %c8 = arith.constant 8 : index
    %63 = vector.load %arg2[%c0_28, %c0_29, %c8] : memref<1x8x32xbf16, #tpu.memory_space<vmem>>, vector<1x8x8xbf16>
    %64 = vector.shape_cast %63 : vector<1x8x8xbf16> to vector<8x8xbf16>
    %c0_30 = arith.constant 0 : index
    %c0_31 = arith.constant 0 : index
    %c8_32 = arith.constant 8 : index
    %65 = vector.load %arg3[%c0_30, %c0_31, %c8_32] : memref<1x8x32xbf16, #tpu.memory_space<vmem>>, vector<1x8x8xbf16>
    %66 = vector.shape_cast %65 : vector<1x8x8xbf16> to vector<8x8xbf16>
    %c0_33 = arith.constant 0 : index
    %c0_34 = arith.constant 0 : index
    %c8_35 = arith.constant 8 : index
    %67 = vector.load %arg4[%c0_33, %c0_34, %c8_35] : memref<1x8x32xbf16, #tpu.memory_space<vmem>>, vector<1x8x8xbf16>
    %68 = vector.shape_cast %67 : vector<1x8x8xbf16> to vector<8x8xbf16>
    %69 = arith.extf %64 : vector<8x8xbf16> to vector<8x8xf32>
    %70 = arith.extf %66 : vector<8x8xbf16> to vector<8x8xf32>
    %cst_36 = arith.constant dense<0.000000e+00> : vector<8x16xf32>
    %71 = tpu.matmul %64, %0, %cst_36 {dimension_numbers = #tpu.dot_dimension_numbers<[1], [0], [0], [1], [0, 0, 1, 1], [], []>} : vector<8x8xbf16>, vector<8x16xbf16>, vector<8x16xf32> -> vector<8x16xf32>
    %cst_37 = arith.constant dense<0.000000e+00> : vector<8x16xf32>
    %72 = tpu.matmul %66, %0, %cst_37 {dimension_numbers = #tpu.dot_dimension_numbers<[1], [0], [0], [1], [0, 0, 1, 1], [], []>} : vector<8x8xbf16>, vector<8x16xbf16>, vector<8x16xf32> -> vector<8x16xf32>
    %73 = arith.mulf %69, %69 : vector<8x8xf32>
    %cst_38 = arith.constant dense<0.000000e+00> : vector<8xf32>
    %74 = vector.multi_reduction <add>, %73, %cst_38 [1] : vector<8x8xf32> to vector<8xf32>
    %75 = vector.shape_cast %74 : vector<8xf32> to vector<8x1xf32>
    %cst_39 = arith.constant 0.176776692 : f32
    %76 = vector.broadcast %cst_39 : f32 to vector<8x1xf32>
    %77 = arith.mulf %76, %75 : vector<8x1xf32>
    %78 = arith.mulf %70, %70 : vector<8x8xf32>
    %cst_40 = arith.constant dense<0.000000e+00> : vector<8xf32>
    %79 = vector.multi_reduction <add>, %78, %cst_40 [1] : vector<8x8xf32> to vector<8xf32>
    %80 = vector.shape_cast %79 : vector<8xf32> to vector<8x1xf32>
    %cst_41 = arith.constant 0.176776692 : f32
    %81 = vector.broadcast %cst_41 : f32 to vector<8x1xf32>
    %82 = arith.mulf %81, %80 : vector<8x1xf32>
    %83 = vector.broadcast %77 : vector<8x1xf32> to vector<8x16xf32>
    %84 = arith.subf %71, %83 : vector<8x16xf32>
    %cst_42 = arith.constant dense<0xFF800000> : vector<8xf32>
    %85 = vector.multi_reduction <maximumf>, %71, %cst_42 [1] : vector<8x16xf32> to vector<8xf32>
    %86 = vector.shape_cast %85 : vector<8xf32> to vector<8x1xf32>
    %87 = vector.broadcast %86 : vector<8x1xf32> to vector<8x16xf32>
    %88 = arith.subf %84, %87 : vector<8x16xf32>
    %89 = math.exp %88 : vector<8x16xf32>
    %cst_43 = arith.constant 9.99999974E-5 : f32
    %90 = vector.broadcast %cst_43 : f32 to vector<8x16xf32>
    %91 = arith.addf %89, %90 : vector<8x16xf32>
    %cst_44 = arith.constant 2.500000e-01 : f32
    %92 = vector.broadcast %cst_44 : f32 to vector<8x16xf32>
    %93 = arith.mulf %92, %91 : vector<8x16xf32>
    %94 = vector.broadcast %82 : vector<8x1xf32> to vector<8x16xf32>
    %95 = arith.subf %72, %94 : vector<8x16xf32>
    %96 = vector.shape_cast %72 : vector<8x16xf32> to vector<1x8x16xf32>
    %cst_45 = arith.constant dense<0xFF800000> : vector<1xf32>
    %97 = vector.multi_reduction <maximumf>, %96, %cst_45 [1, 2] : vector<1x8x16xf32> to vector<1xf32>
    %98 = vector.shape_cast %97 : vector<1xf32> to vector<1x1x1xf32>
    %99 = vector.extract %98[0, 0, 0] : f32 from vector<1x1x1xf32>
    %100 = vector.broadcast %99 : f32 to vector<8x16xf32>
    %101 = arith.subf %95, %100 : vector<8x16xf32>
    %102 = math.exp %101 : vector<8x16xf32>
    %cst_46 = arith.constant 9.99999974E-5 : f32
    %103 = vector.broadcast %cst_46 : f32 to vector<8x16xf32>
    %104 = arith.addf %102, %103 : vector<8x16xf32>
    %cst_47 = arith.constant 2.500000e-01 : f32
    %105 = vector.broadcast %cst_47 : f32 to vector<8x16xf32>
    %106 = arith.mulf %105, %104 : vector<8x16xf32>
    %cst_48 = arith.constant dense<0.000000e+00> : vector<16xf32>
    %107 = vector.multi_reduction <add>, %106, %cst_48 [0] : vector<8x16xf32> to vector<16xf32>
    %108 = vector.shape_cast %107 : vector<16xf32> to vector<1x16xf32>
    %109 = vector.broadcast %108 : vector<1x16xf32> to vector<8x16xf32>
    %110 = arith.mulf %93, %109 : vector<8x16xf32>
    %cst_49 = arith.constant dense<0.000000e+00> : vector<8xf32>
    %111 = vector.multi_reduction <add>, %110, %cst_49 [1] : vector<8x16xf32> to vector<8xf32>
    %112 = vector.shape_cast %111 : vector<8xf32> to vector<8x1xf32>
    %113 = tpu.reciprocal %112 {approx = true} : vector<8x1xf32> -> vector<8x1xf32>
    %114 = arith.truncf %106 : vector<8x16xf32> to vector<8x16xbf16>
    "tpu.trace_start"() <{level = 10 : i32, message = "nm,nd->md"}> : () -> ()
    %cst_50 = arith.constant dense<0.000000e+00> : vector<16x8xf32>
    %115 = tpu.matmul %114, %68, %cst_50 {dimension_numbers = #tpu.dot_dimension_numbers<[0], [0], [1], [1], [0, 1, 1, 1], [], []>} : vector<8x16xbf16>, vector<8x8xbf16>, vector<16x8xf32> -> vector<16x8xf32>
    "tpu.trace_stop"() : () -> ()
    %116 = arith.truncf %93 : vector<8x16xf32> to vector<8x16xbf16>
    %117 = arith.truncf %115 : vector<16x8xf32> to vector<16x8xbf16>
    "tpu.trace_start"() <{level = 10 : i32, message = "nm,md->nd"}> : () -> ()
    %cst_51 = arith.constant dense<0.000000e+00> : vector<8x8xf32>
    %118 = tpu.matmul %116, %117, %cst_51 {dimension_numbers = #tpu.dot_dimension_numbers<[1], [0], [0], [1], [0, 0, 1, 1], [], []>} : vector<8x16xbf16>, vector<16x8xbf16>, vector<8x8xf32> -> vector<8x8xf32>
    "tpu.trace_stop"() : () -> ()
    %119 = vector.broadcast %113 : vector<8x1xf32> to vector<8x8xf32>
    %120 = arith.mulf %118, %119 : vector<8x8xf32>
    %121 = arith.truncf %120 : vector<8x8xf32> to vector<8x8xbf16>
    %c0_52 = arith.constant 0 : index
    %c0_53 = arith.constant 0 : index
    %c8_54 = arith.constant 8 : index
    %122 = vector.load %arg6[%c0_52, %c0_53, %c8_54] : memref<1x8x32xbf16, #tpu.memory_space<vmem>>, vector<1x8x8xbf16>
    %123 = vector.shape_cast %122 : vector<1x8x8xbf16> to vector<8x8xbf16>
    %124 = vector.shape_cast %121 : vector<8x8xbf16> to vector<1x8x8xbf16>
    tpu.vector_store %arg6[%c0_52, %c0_53, %c8_54], %124 {strides = array<i32>} : memref<1x8x32xbf16, #tpu.memory_space<vmem>>, vector<1x8x8xbf16>,
    %c0_55 = arith.constant 0 : index
    %c0_56 = arith.constant 0 : index
    %c16 = arith.constant 16 : index
    %125 = vector.load %arg2[%c0_55, %c0_56, %c16] : memref<1x8x32xbf16, #tpu.memory_space<vmem>>, vector<1x8x8xbf16>
    %126 = vector.shape_cast %125 : vector<1x8x8xbf16> to vector<8x8xbf16>
    %c0_57 = arith.constant 0 : index
    %c0_58 = arith.constant 0 : index
    %c16_59 = arith.constant 16 : index
    %127 = vector.load %arg3[%c0_57, %c0_58, %c16_59] : memref<1x8x32xbf16, #tpu.memory_space<vmem>>, vector<1x8x8xbf16>
    %128 = vector.shape_cast %127 : vector<1x8x8xbf16> to vector<8x8xbf16>
    %c0_60 = arith.constant 0 : index
    %c0_61 = arith.constant 0 : index
    %c16_62 = arith.constant 16 : index
    %129 = vector.load %arg4[%c0_60, %c0_61, %c16_62] : memref<1x8x32xbf16, #tpu.memory_space<vmem>>, vector<1x8x8xbf16>
    %130 = vector.shape_cast %129 : vector<1x8x8xbf16> to vector<8x8xbf16>
    %131 = arith.extf %126 : vector<8x8xbf16> to vector<8x8xf32>
    %132 = arith.extf %128 : vector<8x8xbf16> to vector<8x8xf32>
    %cst_63 = arith.constant dense<0.000000e+00> : vector<8x16xf32>
    %133 = tpu.matmul %126, %0, %cst_63 {dimension_numbers = #tpu.dot_dimension_numbers<[1], [0], [0], [1], [0, 0, 1, 1], [], []>} : vector<8x8xbf16>, vector<8x16xbf16>, vector<8x16xf32> -> vector<8x16xf32>
    %cst_64 = arith.constant dense<0.000000e+00> : vector<8x16xf32>
    %134 = tpu.matmul %128, %0, %cst_64 {dimension_numbers = #tpu.dot_dimension_numbers<[1], [0], [0], [1], [0, 0, 1, 1], [], []>} : vector<8x8xbf16>, vector<8x16xbf16>, vector<8x16xf32> -> vector<8x16xf32>
    %135 = arith.mulf %131, %131 : vector<8x8xf32>
    %cst_65 = arith.constant dense<0.000000e+00> : vector<8xf32>
    %136 = vector.multi_reduction <add>, %135, %cst_65 [1] : vector<8x8xf32> to vector<8xf32>
    %137 = vector.shape_cast %136 : vector<8xf32> to vector<8x1xf32>
    %cst_66 = arith.constant 0.176776692 : f32
    %138 = vector.broadcast %cst_66 : f32 to vector<8x1xf32>
    %139 = arith.mulf %138, %137 : vector<8x1xf32>
    %140 = arith.mulf %132, %132 : vector<8x8xf32>
    %cst_67 = arith.constant dense<0.000000e+00> : vector<8xf32>
    %141 = vector.multi_reduction <add>, %140, %cst_67 [1] : vector<8x8xf32> to vector<8xf32>
    %142 = vector.shape_cast %141 : vector<8xf32> to vector<8x1xf32>
    %cst_68 = arith.constant 0.176776692 : f32
    %143 = vector.broadcast %cst_68 : f32 to vector<8x1xf32>
    %144 = arith.mulf %143, %142 : vector<8x1xf32>
    %145 = vector.broadcast %139 : vector<8x1xf32> to vector<8x16xf32>
    %146 = arith.subf %133, %145 : vector<8x16xf32>
    %cst_69 = arith.constant dense<0xFF800000> : vector<8xf32>
    %147 = vector.multi_reduction <maximumf>, %133, %cst_69 [1] : vector<8x16xf32> to vector<8xf32>
    %148 = vector.shape_cast %147 : vector<8xf32> to vector<8x1xf32>
    %149 = vector.broadcast %148 : vector<8x1xf32> to vector<8x16xf32>
    %150 = arith.subf %146, %149 : vector<8x16xf32>
    %151 = math.exp %150 : vector<8x16xf32>
    %cst_70 = arith.constant 9.99999974E-5 : f32
    %152 = vector.broadcast %cst_70 : f32 to vector<8x16xf32>
    %153 = arith.addf %151, %152 : vector<8x16xf32>
    %cst_71 = arith.constant 2.500000e-01 : f32
    %154 = vector.broadcast %cst_71 : f32 to vector<8x16xf32>
    %155 = arith.mulf %154, %153 : vector<8x16xf32>
    %156 = vector.broadcast %144 : vector<8x1xf32> to vector<8x16xf32>
    %157 = arith.subf %134, %156 : vector<8x16xf32>
    %158 = vector.shape_cast %134 : vector<8x16xf32> to vector<1x8x16xf32>
    %cst_72 = arith.constant dense<0xFF800000> : vector<1xf32>
    %159 = vector.multi_reduction <maximumf>, %158, %cst_72 [1, 2] : vector<1x8x16xf32> to vector<1xf32>
    %160 = vector.shape_cast %159 : vector<1xf32> to vector<1x1x1xf32>
    %161 = vector.extract %160[0, 0, 0] : f32 from vector<1x1x1xf32>
    %162 = vector.broadcast %161 : f32 to vector<8x16xf32>
    %163 = arith.subf %157, %162 : vector<8x16xf32>
    %164 = math.exp %163 : vector<8x16xf32>
    %cst_73 = arith.constant 9.99999974E-5 : f32
    %165 = vector.broadcast %cst_73 : f32 to vector<8x16xf32>
    %166 = arith.addf %164, %165 : vector<8x16xf32>
    %cst_74 = arith.constant 2.500000e-01 : f32
    %167 = vector.broadcast %cst_74 : f32 to vector<8x16xf32>
    %168 = arith.mulf %167, %166 : vector<8x16xf32>
    %cst_75 = arith.constant dense<0.000000e+00> : vector<16xf32>
    %169 = vector.multi_reduction <add>, %168, %cst_75 [0] : vector<8x16xf32> to vector<16xf32>
    %170 = vector.shape_cast %169 : vector<16xf32> to vector<1x16xf32>
    %171 = vector.broadcast %170 : vector<1x16xf32> to vector<8x16xf32>
    %172 = arith.mulf %155, %171 : vector<8x16xf32>
    %cst_76 = arith.constant dense<0.000000e+00> : vector<8xf32>
    %173 = vector.multi_reduction <add>, %172, %cst_76 [1] : vector<8x16xf32> to vector<8xf32>
    %174 = vector.shape_cast %173 : vector<8xf32> to vector<8x1xf32>
    %175 = tpu.reciprocal %174 {approx = true} : vector<8x1xf32> -> vector<8x1xf32>
    %176 = arith.truncf %168 : vector<8x16xf32> to vector<8x16xbf16>
    "tpu.trace_start"() <{level = 10 : i32, message = "nm,nd->md"}> : () -> ()
    %cst_77 = arith.constant dense<0.000000e+00> : vector<16x8xf32>
    %177 = tpu.matmul %176, %130, %cst_77 {dimension_numbers = #tpu.dot_dimension_numbers<[0], [0], [1], [1], [0, 1, 1, 1], [], []>} : vector<8x16xbf16>, vector<8x8xbf16>, vector<16x8xf32> -> vector<16x8xf32>
    "tpu.trace_stop"() : () -> ()
    %178 = arith.truncf %155 : vector<8x16xf32> to vector<8x16xbf16>
    %179 = arith.truncf %177 : vector<16x8xf32> to vector<16x8xbf16>
    "tpu.trace_start"() <{level = 10 : i32, message = "nm,md->nd"}> : () -> ()
    %cst_78 = arith.constant dense<0.000000e+00> : vector<8x8xf32>
    %180 = tpu.matmul %178, %179, %cst_78 {dimension_numbers = #tpu.dot_dimension_numbers<[1], [0], [0], [1], [0, 0, 1, 1], [], []>} : vector<8x16xbf16>, vector<16x8xbf16>, vector<8x8xf32> -> vector<8x8xf32>
    "tpu.trace_stop"() : () -> ()
    %181 = vector.broadcast %175 : vector<8x1xf32> to vector<8x8xf32>
    %182 = arith.mulf %180, %181 : vector<8x8xf32>
    %183 = arith.truncf %182 : vector<8x8xf32> to vector<8x8xbf16>
    %c0_79 = arith.constant 0 : index
    %c0_80 = arith.constant 0 : index
    %c16_81 = arith.constant 16 : index
    %184 = vector.load %arg6[%c0_79, %c0_80, %c16_81] : memref<1x8x32xbf16, #tpu.memory_space<vmem>>, vector<1x8x8xbf16>
    %185 = vector.shape_cast %184 : vector<1x8x8xbf16> to vector<8x8xbf16>
    %186 = vector.shape_cast %183 : vector<8x8xbf16> to vector<1x8x8xbf16>
    tpu.vector_store %arg6[%c0_79, %c0_80, %c16_81], %186 {strides = array<i32>} : memref<1x8x32xbf16, #tpu.memory_space<vmem>>, vector<1x8x8xbf16>,
    %c0_82 = arith.constant 0 : index
    %c0_83 = arith.constant 0 : index
    %c24 = arith.constant 24 : index
    %187 = vector.load %arg2[%c0_82, %c0_83, %c24] : memref<1x8x32xbf16, #tpu.memory_space<vmem>>, vector<1x8x8xbf16>
    %188 = vector.shape_cast %187 : vector<1x8x8xbf16> to vector<8x8xbf16>
    %c0_84 = arith.constant 0 : index
    %c0_85 = arith.constant 0 : index
    %c24_86 = arith.constant 24 : index
    %189 = vector.load %arg3[%c0_84, %c0_85, %c24_86] : memref<1x8x32xbf16, #tpu.memory_space<vmem>>, vector<1x8x8xbf16>
    %190 = vector.shape_cast %189 : vector<1x8x8xbf16> to vector<8x8xbf16>
    %c0_87 = arith.constant 0 : index
    %c0_88 = arith.constant 0 : index
    %c24_89 = arith.constant 24 : index
    %191 = vector.load %arg4[%c0_87, %c0_88, %c24_89] : memref<1x8x32xbf16, #tpu.memory_space<vmem>>, vector<1x8x8xbf16>
    %192 = vector.shape_cast %191 : vector<1x8x8xbf16> to vector<8x8xbf16>
    %193 = arith.extf %188 : vector<8x8xbf16> to vector<8x8xf32>
    %194 = arith.extf %190 : vector<8x8xbf16> to vector<8x8xf32>
    %cst_90 = arith.constant dense<0.000000e+00> : vector<8x16xf32>
    %195 = tpu.matmul %188, %0, %cst_90 {dimension_numbers = #tpu.dot_dimension_numbers<[1], [0], [0], [1], [0, 0, 1, 1], [], []>} : vector<8x8xbf16>, vector<8x16xbf16>, vector<8x16xf32> -> vector<8x16xf32>
    %cst_91 = arith.constant dense<0.000000e+00> : vector<8x16xf32>
    %196 = tpu.matmul %190, %0, %cst_91 {dimension_numbers = #tpu.dot_dimension_numbers<[1], [0], [0], [1], [0, 0, 1, 1], [], []>} : vector<8x8xbf16>, vector<8x16xbf16>, vector<8x16xf32> -> vector<8x16xf32>
    %197 = arith.mulf %193, %193 : vector<8x8xf32>
    %cst_92 = arith.constant dense<0.000000e+00> : vector<8xf32>
    %198 = vector.multi_reduction <add>, %197, %cst_92 [1] : vector<8x8xf32> to vector<8xf32>
    %199 = vector.shape_cast %198 : vector<8xf32> to vector<8x1xf32>
    %cst_93 = arith.constant 0.176776692 : f32
    %200 = vector.broadcast %cst_93 : f32 to vector<8x1xf32>
    %201 = arith.mulf %200, %199 : vector<8x1xf32>
    %202 = arith.mulf %194, %194 : vector<8x8xf32>
    %cst_94 = arith.constant dense<0.000000e+00> : vector<8xf32>
    %203 = vector.multi_reduction <add>, %202, %cst_94 [1] : vector<8x8xf32> to vector<8xf32>
    %204 = vector.shape_cast %203 : vector<8xf32> to vector<8x1xf32>
    %cst_95 = arith.constant 0.176776692 : f32
    %205 = vector.broadcast %cst_95 : f32 to vector<8x1xf32>
    %206 = arith.mulf %205, %204 : vector<8x1xf32>
    %207 = vector.broadcast %201 : vector<8x1xf32> to vector<8x16xf32>
    %208 = arith.subf %195, %207 : vector<8x16xf32>
    %cst_96 = arith.constant dense<0xFF800000> : vector<8xf32>
    %209 = vector.multi_reduction <maximumf>, %195, %cst_96 [1] : vector<8x16xf32> to vector<8xf32>
    %210 = vector.shape_cast %209 : vector<8xf32> to vector<8x1xf32>
    %211 = vector.broadcast %210 : vector<8x1xf32> to vector<8x16xf32>
    %212 = arith.subf %208, %211 : vector<8x16xf32>
    %213 = math.exp %212 : vector<8x16xf32>
    %cst_97 = arith.constant 9.99999974E-5 : f32
    %214 = vector.broadcast %cst_97 : f32 to vector<8x16xf32>
    %215 = arith.addf %213, %214 : vector<8x16xf32>
    %cst_98 = arith.constant 2.500000e-01 : f32
    %216 = vector.broadcast %cst_98 : f32 to vector<8x16xf32>
    %217 = arith.mulf %216, %215 : vector<8x16xf32>
    %218 = vector.broadcast %206 : vector<8x1xf32> to vector<8x16xf32>
    %219 = arith.subf %196, %218 : vector<8x16xf32>
    %220 = vector.shape_cast %196 : vector<8x16xf32> to vector<1x8x16xf32>
    %cst_99 = arith.constant dense<0xFF800000> : vector<1xf32>
    %221 = vector.multi_reduction <maximumf>, %220, %cst_99 [1, 2] : vector<1x8x16xf32> to vector<1xf32>
    %222 = vector.shape_cast %221 : vector<1xf32> to vector<1x1x1xf32>
    %223 = vector.extract %222[0, 0, 0] : f32 from vector<1x1x1xf32>
    %224 = vector.broadcast %223 : f32 to vector<8x16xf32>
    %225 = arith.subf %219, %224 : vector<8x16xf32>
    %226 = math.exp %225 : vector<8x16xf32>
    %cst_100 = arith.constant 9.99999974E-5 : f32
    %227 = vector.broadcast %cst_100 : f32 to vector<8x16xf32>
    %228 = arith.addf %226, %227 : vector<8x16xf32>
    %cst_101 = arith.constant 2.500000e-01 : f32
    %229 = vector.broadcast %cst_101 : f32 to vector<8x16xf32>
    %230 = arith.mulf %229, %228 : vector<8x16xf32>
    %cst_102 = arith.constant dense<0.000000e+00> : vector<16xf32>
    %231 = vector.multi_reduction <add>, %230, %cst_102 [0] : vector<8x16xf32> to vector<16xf32>
    %232 = vector.shape_cast %231 : vector<16xf32> to vector<1x16xf32>
    %233 = vector.broadcast %232 : vector<1x16xf32> to vector<8x16xf32>
    %234 = arith.mulf %217, %233 : vector<8x16xf32>
    %cst_103 = arith.constant dense<0.000000e+00> : vector<8xf32>
    %235 = vector.multi_reduction <add>, %234, %cst_103 [1] : vector<8x16xf32> to vector<8xf32>
    %236 = vector.shape_cast %235 : vector<8xf32> to vector<8x1xf32>
    %237 = tpu.reciprocal %236 {approx = true} : vector<8x1xf32> -> vector<8x1xf32>
    %238 = arith.truncf %230 : vector<8x16xf32> to vector<8x16xbf16>
    "tpu.trace_start"() <{level = 10 : i32, message = "nm,nd->md"}> : () -> ()
    %cst_104 = arith.constant dense<0.000000e+00> : vector<16x8xf32>
    %239 = tpu.matmul %238, %192, %cst_104 {dimension_numbers = #tpu.dot_dimension_numbers<[0], [0], [1], [1], [0, 1, 1, 1], [], []>} : vector<8x16xbf16>, vector<8x8xbf16>, vector<16x8xf32> -> vector<16x8xf32>
    "tpu.trace_stop"() : () -> ()
    %240 = arith.truncf %217 : vector<8x16xf32> to vector<8x16xbf16>
    %241 = arith.truncf %239 : vector<16x8xf32> to vector<16x8xbf16>
    "tpu.trace_start"() <{level = 10 : i32, message = "nm,md->nd"}> : () -> ()
    %cst_105 = arith.constant dense<0.000000e+00> : vector<8x8xf32>
    %242 = tpu.matmul %240, %241, %cst_105 {dimension_numbers = #tpu.dot_dimension_numbers<[1], [0], [0], [1], [0, 0, 1, 1], [], []>} : vector<8x16xbf16>, vector<16x8xbf16>, vector<8x8xf32> -> vector<8x8xf32>
    "tpu.trace_stop"() : () -> ()
    %243 = vector.broadcast %237 : vector<8x1xf32> to vector<8x8xf32>
    %244 = arith.mulf %242, %243 : vector<8x8xf32>
    %245 = arith.truncf %244 : vector<8x8xf32> to vector<8x8xbf16>
    %c0_106 = arith.constant 0 : index
    %c0_107 = arith.constant 0 : index
    %c24_108 = arith.constant 24 : index
    %246 = vector.load %arg6[%c0_106, %c0_107, %c24_108] : memref<1x8x32xbf16, #tpu.memory_space<vmem>>, vector<1x8x8xbf16>
    %247 = vector.shape_cast %246 : vector<1x8x8xbf16> to vector<8x8xbf16>
    %248 = vector.shape_cast %245 : vector<8x8xbf16> to vector<1x8x8xbf16>
    tpu.vector_store %arg6[%c0_106, %c0_107, %c24_108], %248 {strides = array<i32>} : memref<1x8x32xbf16, #tpu.memory_space<vmem>>, vector<1x8x8xbf16>,
    return
  }
  func.func @transform_0(%arg0: i32, %arg1: i32) -> (i32, i32, i32) {
    %c0_i32 = arith.constant 0 : i32
    %c0_i32_0 = arith.constant 0 : i32
    %c0_i32_1 = arith.constant 0 : i32
    return %arg0, %c0_i32, %c0_i32_0 : i32, i32, i32
  }
  func.func @transform_1(%arg0: i32, %arg1: i32) -> (i32, i32, i32) {
    %c0_i32 = arith.constant 0 : i32
    %c0_i32_0 = arith.constant 0 : i32
    %c0_i32_1 = arith.constant 0 : i32
    return %arg0, %c0_i32, %c0_i32_0 : i32, i32, i32
  }
  func.func @transform_2(%arg0: i32, %arg1: i32) -> (i32, i32, i32) {
    %c0_i32 = arith.constant 0 : i32
    %c0_i32_0 = arith.constant 0 : i32
    %c0_i32_1 = arith.constant 0 : i32
    return %arg0, %c0_i32, %c0_i32_0 : i32, i32, i32
  }
  func.func @transform_3(%arg0: i32, %arg1: i32) -> (i32, i32) {
    %c0_i32 = arith.constant 0 : i32
    %c0_i32_0 = arith.constant 0 : i32
    %c0_i32_1 = arith.constant 0 : i32
    return %c0_i32, %c0_i32_0 : i32, i32
  }
  func.func @transform_4(%arg0: i32, %arg1: i32) -> (i32, i32, i32) {
    %c0_i32 = arith.constant 0 : i32
    %c0_i32_0 = arith.constant 0 : i32
    return %arg0, %c0_i32, %arg1 : i32, i32, i32
  }
}

module attributes {stable_mosaic.version = 11 : i64} {
  func.func @kernel(%arg0: i32, %arg1: i32, %arg2: memref<16x32xf32, #tpu.memory_space<vmem>>, %arg3: memref<1x32xf32, #tpu.memory_space<vmem>>, %arg4: memref<1x32xf32, #tpu.memory_space<vmem>>, %arg5: memref<32x96xbf16, #tpu.memory_space<vmem>>, %arg6: memref<1x96xf32, #tpu.memory_space<vmem>>, %arg7: memref<16x96xbf16, #tpu.memory_space<vmem>>) attributes {dimension_semantics = [#tpu.dimension_semantics<parallel>, #tpu.dimension_semantics<parallel>], iteration_bounds = array<i64: 1, 1>, scalar_prefetch = 0 : i64, scratch_operands = 0 : i64, tpu.core_type = #tpu.core_type<tc>, window_params = [{transform_indices = @transform_0, window_bounds = array<i64: 16, 32>}, {pipeline_mode = #tpu.pipeline_mode<synchronous>, transform_indices = @transform_1, window_bounds = array<i64: 1, 32>}, {pipeline_mode = #tpu.pipeline_mode<synchronous>, transform_indices = @transform_2, window_bounds = array<i64: 1, 32>}, {transform_indices = @transform_3, window_bounds = array<i64: 32, 96>}, {transform_indices = @transform_4, window_bounds = array<i64: 1, 96>}, {transform_indices = @transform_5, window_bounds = array<i64: 16, 96>}]} {
    %c0 = arith.constant 0 : index
    %c0_0 = arith.constant 0 : index
    %0 = vector.load %arg2[%c0, %c0_0] : memref<16x32xf32, #tpu.memory_space<vmem>>, vector<16x32xf32>
    %c0_1 = arith.constant 0 : index
    %c0_2 = arith.constant 0 : index
    %1 = vector.load %arg3[%c0_1, %c0_2] : memref<1x32xf32, #tpu.memory_space<vmem>>, vector<1x32xf32>
    %c0_3 = arith.constant 0 : index
    %c0_4 = arith.constant 0 : index
    %2 = vector.load %arg4[%c0_3, %c0_4] : memref<1x32xf32, #tpu.memory_space<vmem>>, vector<1x32xf32>
    %cst = arith.constant dense<0.000000e+00> : vector<16xf32>
    %3 = vector.multi_reduction <add>, %0, %cst [1] : vector<16x32xf32> to vector<16xf32>
    %4 = vector.shape_cast %3 : vector<16xf32> to vector<16x1xf32>
    %cst_5 = arith.constant 3.200000e+01 : f32
    %5 = vector.broadcast %cst_5 : f32 to vector<16x1xf32>
    %6 = arith.divf %4, %5 : vector<16x1xf32>
    %7 = vector.broadcast %6 : vector<16x1xf32> to vector<16x32xf32>
    %8 = arith.subf %0, %7 : vector<16x32xf32>
    %9 = arith.mulf %8, %8 : vector<16x32xf32>
    %cst_6 = arith.constant dense<0.000000e+00> : vector<16xf32>
    %10 = vector.multi_reduction <add>, %9, %cst_6 [1] : vector<16x32xf32> to vector<16xf32>
    %11 = vector.shape_cast %10 : vector<16xf32> to vector<16x1xf32>
    %cst_7 = arith.constant 3.200000e+01 : f32
    %12 = vector.broadcast %cst_7 : f32 to vector<16x1xf32>
    %13 = arith.divf %11, %12 : vector<16x1xf32>
    %14 = vector.broadcast %6 : vector<16x1xf32> to vector<16x32xf32>
    %15 = arith.subf %0, %14 : vector<16x32xf32>
    %cst_8 = arith.constant 9.99999974E-6 : f32
    %16 = vector.broadcast %cst_8 : f32 to vector<16x1xf32>
    %17 = arith.addf %13, %16 : vector<16x1xf32>
    %18 = math.rsqrt %17 : vector<16x1xf32>
    %19 = vector.broadcast %18 : vector<16x1xf32> to vector<16x32xf32>
    %20 = arith.mulf %15, %19 : vector<16x32xf32>
    %21 = vector.broadcast %1 : vector<1x32xf32> to vector<16x32xf32>
    %22 = arith.mulf %20, %21 : vector<16x32xf32>
    %23 = vector.broadcast %2 : vector<1x32xf32> to vector<16x32xf32>
    %24 = arith.addf %22, %23 : vector<16x32xf32>
    %25 = arith.truncf %24 : vector<16x32xf32> to vector<16x32xbf16>
    %c0_9 = arith.constant 0 : index
    %c0_10 = arith.constant 0 : index
    %26 = vector.load %arg5[%c0_9, %c0_10] : memref<32x96xbf16, #tpu.memory_space<vmem>>, vector<32x96xbf16>
    %cst_11 = arith.constant dense<0.000000e+00> : vector<16x96xf32>
    %27 = tpu.matmul %25, %26, %cst_11 {dimension_numbers = #tpu.dot_dimension_numbers<[1], [0], [0], [1], [0, 0, 1, 1], [], []>} : vector<16x32xbf16>, vector<32x96xbf16>, vector<16x96xf32> -> vector<16x96xf32>
    %c0_12 = arith.constant 0 : index
    %c0_13 = arith.constant 0 : index
    %28 = vector.load %arg6[%c0_12, %c0_13] : memref<1x96xf32, #tpu.memory_space<vmem>>, vector<1x96xf32>
    %29 = vector.broadcast %28 : vector<1x96xf32> to vector<16x96xf32>
    %30 = arith.addf %27, %29 : vector<16x96xf32>
    %31 = arith.truncf %30 : vector<16x96xf32> to vector<16x96xbf16>
    %c0_14 = arith.constant 0 : index
    %c0_15 = arith.constant 0 : index
    %32 = vector.load %arg7[%c0_14, %c0_15] : memref<16x96xbf16, #tpu.memory_space<vmem>>, vector<16x96xbf16>
    tpu.vector_store %arg7[%c0_14, %c0_15], %31 {strides = array<i32>} : memref<16x96xbf16, #tpu.memory_space<vmem>>, vector<16x96xbf16>,
    return
  }
  func.func @transform_0(%arg0: i32, %arg1: i32) -> (i32, i32) {
    %c0_i32 = arith.constant 0 : i32
    %c0_i32_0 = arith.constant 0 : i32
    return %arg0, %c0_i32 : i32, i32
  }
  func.func @transform_1(%arg0: i32, %arg1: i32) -> (i32, i32) {
    %c0_i32 = arith.constant 0 : i32
    %c0_i32_0 = arith.constant 0 : i32
    %c0_i32_1 = arith.constant 0 : i32
    return %c0_i32, %c0_i32_0 : i32, i32
  }
  func.func @transform_2(%arg0: i32, %arg1: i32) -> (i32, i32) {
    %c0_i32 = arith.constant 0 : i32
    %c0_i32_0 = arith.constant 0 : i32
    %c0_i32_1 = arith.constant 0 : i32
    return %c0_i32, %c0_i32_0 : i32, i32
  }
  func.func @transform_3(%arg0: i32, %arg1: i32) -> (i32, i32) {
    %c0_i32 = arith.constant 0 : i32
    %c0_i32_0 = arith.constant 0 : i32
    return %c0_i32, %arg1 : i32, i32
  }
  func.func @transform_4(%arg0: i32, %arg1: i32) -> (i32, i32) {
    %c0_i32 = arith.constant 0 : i32
    %c0_i32_0 = arith.constant 0 : i32
    return %c0_i32, %arg1 : i32, i32
  }
  func.func @transform_5(%arg0: i32, %arg1: i32) -> (i32, i32) {
    %c0_i32 = arith.constant 0 : i32
    return %arg0, %arg1 : i32, i32
  }
}

module attributes {stable_mosaic.version = 11 : i64} {
  func.func @kernel(%arg0: i32, %arg1: i32, %arg2: memref<16x32xf32, #tpu.memory_space<vmem>>, %arg3: memref<1x32xf32, #tpu.memory_space<vmem>>, %arg4: memref<1x32xf32, #tpu.memory_space<vmem>>, %arg5: memref<32x64xbf16, #tpu.memory_space<vmem>>, %arg6: memref<1x64xf32, #tpu.memory_space<vmem>>, %arg7: memref<16x64xbf16, #tpu.memory_space<vmem>>) attributes {dimension_semantics = [#tpu.dimension_semantics<parallel>, #tpu.dimension_semantics<parallel>], iteration_bounds = array<i64: 1, 1>, scalar_prefetch = 0 : i64, scratch_operands = 0 : i64, tpu.core_type = #tpu.core_type<tc>, window_params = [{transform_indices = @transform_0, window_bounds = array<i64: 16, 32>}, {pipeline_mode = #tpu.pipeline_mode<synchronous>, transform_indices = @transform_1, window_bounds = array<i64: 1, 32>}, {pipeline_mode = #tpu.pipeline_mode<synchronous>, transform_indices = @transform_2, window_bounds = array<i64: 1, 32>}, {transform_indices = @transform_3, window_bounds = array<i64: 32, 64>}, {transform_indices = @transform_4, window_bounds = array<i64: 1, 64>}, {transform_indices = @transform_5, window_bounds = array<i64: 16, 64>}]} {
    %c0 = arith.constant 0 : index
    %c0_0 = arith.constant 0 : index
    %0 = vector.load %arg2[%c0, %c0_0] : memref<16x32xf32, #tpu.memory_space<vmem>>, vector<16x32xf32>
    %c0_1 = arith.constant 0 : index
    %c0_2 = arith.constant 0 : index
    %1 = vector.load %arg3[%c0_1, %c0_2] : memref<1x32xf32, #tpu.memory_space<vmem>>, vector<1x32xf32>
    %c0_3 = arith.constant 0 : index
    %c0_4 = arith.constant 0 : index
    %2 = vector.load %arg4[%c0_3, %c0_4] : memref<1x32xf32, #tpu.memory_space<vmem>>, vector<1x32xf32>
    %cst = arith.constant dense<0.000000e+00> : vector<16xf32>
    %3 = vector.multi_reduction <add>, %0, %cst [1] : vector<16x32xf32> to vector<16xf32>
    %4 = vector.shape_cast %3 : vector<16xf32> to vector<16x1xf32>
    %cst_5 = arith.constant 3.200000e+01 : f32
    %5 = vector.broadcast %cst_5 : f32 to vector<16x1xf32>
    %6 = arith.divf %4, %5 : vector<16x1xf32>
    %7 = vector.broadcast %6 : vector<16x1xf32> to vector<16x32xf32>
    %8 = arith.subf %0, %7 : vector<16x32xf32>
    %9 = arith.mulf %8, %8 : vector<16x32xf32>
    %cst_6 = arith.constant dense<0.000000e+00> : vector<16xf32>
    %10 = vector.multi_reduction <add>, %9, %cst_6 [1] : vector<16x32xf32> to vector<16xf32>
    %11 = vector.shape_cast %10 : vector<16xf32> to vector<16x1xf32>
    %cst_7 = arith.constant 3.200000e+01 : f32
    %12 = vector.broadcast %cst_7 : f32 to vector<16x1xf32>
    %13 = arith.divf %11, %12 : vector<16x1xf32>
    %14 = vector.broadcast %6 : vector<16x1xf32> to vector<16x32xf32>
    %15 = arith.subf %0, %14 : vector<16x32xf32>
    %cst_8 = arith.constant 9.99999974E-6 : f32
    %16 = vector.broadcast %cst_8 : f32 to vector<16x1xf32>
    %17 = arith.addf %13, %16 : vector<16x1xf32>
    %18 = math.rsqrt %17 : vector<16x1xf32>
    %19 = vector.broadcast %18 : vector<16x1xf32> to vector<16x32xf32>
    %20 = arith.mulf %15, %19 : vector<16x32xf32>
    %21 = vector.broadcast %1 : vector<1x32xf32> to vector<16x32xf32>
    %22 = arith.mulf %20, %21 : vector<16x32xf32>
    %23 = vector.broadcast %2 : vector<1x32xf32> to vector<16x32xf32>
    %24 = arith.addf %22, %23 : vector<16x32xf32>
    %25 = arith.truncf %24 : vector<16x32xf32> to vector<16x32xbf16>
    %c0_9 = arith.constant 0 : index
    %c0_10 = arith.constant 0 : index
    %26 = vector.load %arg5[%c0_9, %c0_10] : memref<32x64xbf16, #tpu.memory_space<vmem>>, vector<32x64xbf16>
    %cst_11 = arith.constant dense<0.000000e+00> : vector<16x64xf32>
    %27 = tpu.matmul %25, %26, %cst_11 {dimension_numbers = #tpu.dot_dimension_numbers<[1], [0], [0], [1], [0, 0, 1, 1], [], []>} : vector<16x32xbf16>, vector<32x64xbf16>, vector<16x64xf32> -> vector<16x64xf32>
    %c0_12 = arith.constant 0 : index
    %c0_13 = arith.constant 0 : index
    %28 = vector.load %arg6[%c0_12, %c0_13] : memref<1x64xf32, #tpu.memory_space<vmem>>, vector<1x64xf32>
    %29 = vector.broadcast %28 : vector<1x64xf32> to vector<16x64xf32>
    %30 = arith.addf %27, %29 : vector<16x64xf32>
    %cst_14 = arith.constant 5.000000e-01 : f32
    %31 = vector.broadcast %cst_14 : f32 to vector<16x64xf32>
    %32 = arith.mulf %31, %30 : vector<16x64xf32>
    %cst_15 = arith.constant 4.471500e-02 : f32
    %33 = vector.broadcast %cst_15 : f32 to vector<16x64xf32>
    %34 = arith.mulf %33, %30 : vector<16x64xf32>
    %35 = arith.mulf %34, %30 : vector<16x64xf32>
    %36 = arith.mulf %35, %30 : vector<16x64xf32>
    %37 = arith.addf %30, %36 : vector<16x64xf32>
    %cst_16 = arith.constant 0.797884583 : f32
    %38 = vector.broadcast %cst_16 : f32 to vector<16x64xf32>
    %39 = arith.mulf %38, %37 : vector<16x64xf32>
    %40 = math.tanh %39 : vector<16x64xf32>
    %cst_17 = arith.constant 1.000000e+00 : f32
    %41 = vector.broadcast %cst_17 : f32 to vector<16x64xf32>
    %42 = arith.addf %41, %40 : vector<16x64xf32>
    %43 = arith.mulf %32, %42 : vector<16x64xf32>
    %44 = arith.truncf %43 : vector<16x64xf32> to vector<16x64xbf16>
    %c0_18 = arith.constant 0 : index
    %c0_19 = arith.constant 0 : index
    %45 = vector.load %arg7[%c0_18, %c0_19] : memref<16x64xbf16, #tpu.memory_space<vmem>>, vector<16x64xbf16>
    tpu.vector_store %arg7[%c0_18, %c0_19], %44 {strides = array<i32>} : memref<16x64xbf16, #tpu.memory_space<vmem>>, vector<16x64xbf16>,
    return
  }
  func.func @transform_0(%arg0: i32, %arg1: i32) -> (i32, i32) {
    %c0_i32 = arith.constant 0 : i32
    %c0_i32_0 = arith.constant 0 : i32
    return %arg0, %c0_i32 : i32, i32
  }
  func.func @transform_1(%arg0: i32, %arg1: i32) -> (i32, i32) {
    %c0_i32 = arith.constant 0 : i32
    %c0_i32_0 = arith.constant 0 : i32
    %c0_i32_1 = arith.constant 0 : i32
    return %c0_i32, %c0_i32_0 : i32, i32
  }
  func.func @transform_2(%arg0: i32, %arg1: i32) -> (i32, i32) {
    %c0_i32 = arith.constant 0 : i32
    %c0_i32_0 = arith.constant 0 : i32
    %c0_i32_1 = arith.constant 0 : i32
    return %c0_i32, %c0_i32_0 : i32, i32
  }
  func.func @transform_3(%arg0: i32, %arg1: i32) -> (i32, i32) {
    %c0_i32 = arith.constant 0 : i32
    %c0_i32_0 = arith.constant 0 : i32
    return %c0_i32, %arg1 : i32, i32
  }
  func.func @transform_4(%arg0: i32, %arg1: i32) -> (i32, i32) {
    %c0_i32 = arith.constant 0 : i32
    %c0_i32_0 = arith.constant 0 : i32
    return %c0_i32, %arg1 : i32, i32
  }
  func.func @transform_5(%arg0: i32, %arg1: i32) -> (i32, i32) {
    %c0_i32 = arith.constant 0 : i32
    return %arg0, %arg1 : i32, i32
  }
}

module attributes {stable_mosaic.version = 11 : i64} {
  func.func @_linear_residual_kernel(%arg0: i32, %arg1: i32, %arg2: memref<16x64xbf16, #tpu.memory_space<vmem>>, %arg3: memref<64x32xbf16, #tpu.memory_space<vmem>>, %arg4: memref<1x32xf32, #tpu.memory_space<vmem>>, %arg5: memref<16x32xf32, #tpu.memory_space<vmem>>, %arg6: memref<16x32xf32, #tpu.memory_space<vmem>>) attributes {dimension_semantics = [#tpu.dimension_semantics<parallel>, #tpu.dimension_semantics<parallel>], iteration_bounds = array<i64: 1, 1>, scalar_prefetch = 0 : i64, scratch_operands = 0 : i64, tpu.core_type = #tpu.core_type<tc>, window_params = [{transform_indices = @transform_0, window_bounds = array<i64: 16, 64>}, {transform_indices = @transform_1, window_bounds = array<i64: 64, 32>}, {transform_indices = @transform_2, window_bounds = array<i64: 1, 32>}, {transform_indices = @transform_3, window_bounds = array<i64: 16, 32>}, {transform_indices = @transform_4, window_bounds = array<i64: 16, 32>}]} {
    %c0 = arith.constant 0 : index
    %c0_0 = arith.constant 0 : index
    %0 = vector.load %arg2[%c0, %c0_0] : memref<16x64xbf16, #tpu.memory_space<vmem>>, vector<16x64xbf16>
    %c0_1 = arith.constant 0 : index
    %c0_2 = arith.constant 0 : index
    %1 = vector.load %arg3[%c0_1, %c0_2] : memref<64x32xbf16, #tpu.memory_space<vmem>>, vector<64x32xbf16>
    %cst = arith.constant dense<0.000000e+00> : vector<16x32xf32>
    %2 = tpu.matmul %0, %1, %cst {dimension_numbers = #tpu.dot_dimension_numbers<[1], [0], [0], [1], [0, 0, 1, 1], [], []>} : vector<16x64xbf16>, vector<64x32xbf16>, vector<16x32xf32> -> vector<16x32xf32>
    %c0_3 = arith.constant 0 : index
    %c0_4 = arith.constant 0 : index
    %3 = vector.load %arg4[%c0_3, %c0_4] : memref<1x32xf32, #tpu.memory_space<vmem>>, vector<1x32xf32>
    %4 = vector.broadcast %3 : vector<1x32xf32> to vector<16x32xf32>
    %5 = arith.addf %2, %4 : vector<16x32xf32>
    %c0_5 = arith.constant 0 : index
    %c0_6 = arith.constant 0 : index
    %6 = vector.load %arg5[%c0_5, %c0_6] : memref<16x32xf32, #tpu.memory_space<vmem>>, vector<16x32xf32>
    %7 = arith.addf %6, %5 : vector<16x32xf32>
    %c0_7 = arith.constant 0 : index
    %c0_8 = arith.constant 0 : index
    %8 = vector.load %arg6[%c0_7, %c0_8] : memref<16x32xf32, #tpu.memory_space<vmem>>, vector<16x32xf32>
    tpu.vector_store %arg6[%c0_7, %c0_8], %7 {strides = array<i32>} : memref<16x32xf32, #tpu.memory_space<vmem>>, vector<16x32xf32>,
    return
  }
  func.func @transform_0(%arg0: i32, %arg1: i32) -> (i32, i32) {
    %c0_i32 = arith.constant 0 : i32
    %c0_i32_0 = arith.constant 0 : i32
    return %arg0, %c0_i32 : i32, i32
  }
  func.func @transform_1(%arg0: i32, %arg1: i32) -> (i32, i32) {
    %c0_i32 = arith.constant 0 : i32
    %c0_i32_0 = arith.constant 0 : i32
    return %c0_i32, %arg1 : i32, i32
  }
  func.func @transform_2(%arg0: i32, %arg1: i32) -> (i32, i32) {
    %c0_i32 = arith.constant 0 : i32
    %c0_i32_0 = arith.constant 0 : i32
    return %c0_i32, %arg1 : i32, i32
  }
  func.func @transform_3(%arg0: i32, %arg1: i32) -> (i32, i32) {
    %c0_i32 = arith.constant 0 : i32
    return %arg0, %arg1 : i32, i32
  }
  func.func @transform_4(%arg0: i32, %arg1: i32) -> (i32, i32) {
    %c0_i32 = arith.constant 0 : i32
    return %arg0, %arg1 : i32, i32
  }
}

module attributes {stable_mosaic.version = 11 : i64} {
  func.func @kernel(%arg0: i32, %arg1: i32, %arg2: memref<16x32xf32, #tpu.memory_space<vmem>>, %arg3: memref<1x32xf32, #tpu.memory_space<vmem>>, %arg4: memref<1x32xf32, #tpu.memory_space<vmem>>, %arg5: memref<32x96xbf16, #tpu.memory_space<vmem>>, %arg6: memref<1x96xf32, #tpu.memory_space<vmem>>, %arg7: memref<16x96xbf16, #tpu.memory_space<vmem>>) attributes {dimension_semantics = [#tpu.dimension_semantics<parallel>, #tpu.dimension_semantics<parallel>], iteration_bounds = array<i64: 1, 1>, scalar_prefetch = 0 : i64, scratch_operands = 0 : i64, tpu.core_type = #tpu.core_type<tc>, window_params = [{transform_indices = @transform_0, window_bounds = array<i64: 16, 32>}, {pipeline_mode = #tpu.pipeline_mode<synchronous>, transform_indices = @transform_1, window_bounds = array<i64: 1, 32>}, {pipeline_mode = #tpu.pipeline_mode<synchronous>, transform_indices = @transform_2, window_bounds = array<i64: 1, 32>}, {transform_indices = @transform_3, window_bounds = array<i64: 32, 96>}, {transform_indices = @transform_4, window_bounds = array<i64: 1, 96>}, {transform_indices = @transform_5, window_bounds = array<i64: 16, 96>}]} {
    %c0 = arith.constant 0 : index
    %c0_0 = arith.constant 0 : index
    %0 = vector.load %arg2[%c0, %c0_0] : memref<16x32xf32, #tpu.memory_space<vmem>>, vector<16x32xf32>
    %c0_1 = arith.constant 0 : index
    %c0_2 = arith.constant 0 : index
    %1 = vector.load %arg3[%c0_1, %c0_2] : memref<1x32xf32, #tpu.memory_space<vmem>>, vector<1x32xf32>
    %c0_3 = arith.constant 0 : index
    %c0_4 = arith.constant 0 : index
    %2 = vector.load %arg4[%c0_3, %c0_4] : memref<1x32xf32, #tpu.memory_space<vmem>>, vector<1x32xf32>
    %cst = arith.constant dense<0.000000e+00> : vector<16xf32>
    %3 = vector.multi_reduction <add>, %0, %cst [1] : vector<16x32xf32> to vector<16xf32>
    %4 = vector.shape_cast %3 : vector<16xf32> to vector<16x1xf32>
    %cst_5 = arith.constant 3.200000e+01 : f32
    %5 = vector.broadcast %cst_5 : f32 to vector<16x1xf32>
    %6 = arith.divf %4, %5 : vector<16x1xf32>
    %7 = vector.broadcast %6 : vector<16x1xf32> to vector<16x32xf32>
    %8 = arith.subf %0, %7 : vector<16x32xf32>
    %9 = arith.mulf %8, %8 : vector<16x32xf32>
    %cst_6 = arith.constant dense<0.000000e+00> : vector<16xf32>
    %10 = vector.multi_reduction <add>, %9, %cst_6 [1] : vector<16x32xf32> to vector<16xf32>
    %11 = vector.shape_cast %10 : vector<16xf32> to vector<16x1xf32>
    %cst_7 = arith.constant 3.200000e+01 : f32
    %12 = vector.broadcast %cst_7 : f32 to vector<16x1xf32>
    %13 = arith.divf %11, %12 : vector<16x1xf32>
    %14 = vector.broadcast %6 : vector<16x1xf32> to vector<16x32xf32>
    %15 = arith.subf %0, %14 : vector<16x32xf32>
    %cst_8 = arith.constant 9.99999974E-6 : f32
    %16 = vector.broadcast %cst_8 : f32 to vector<16x1xf32>
    %17 = arith.addf %13, %16 : vector<16x1xf32>
    %18 = math.rsqrt %17 : vector<16x1xf32>
    %19 = vector.broadcast %18 : vector<16x1xf32> to vector<16x32xf32>
    %20 = arith.mulf %15, %19 : vector<16x32xf32>
    %21 = vector.broadcast %1 : vector<1x32xf32> to vector<16x32xf32>
    %22 = arith.mulf %20, %21 : vector<16x32xf32>
    %23 = vector.broadcast %2 : vector<1x32xf32> to vector<16x32xf32>
    %24 = arith.addf %22, %23 : vector<16x32xf32>
    %25 = arith.truncf %24 : vector<16x32xf32> to vector<16x32xbf16>
    %c0_9 = arith.constant 0 : index
    %c0_10 = arith.constant 0 : index
    %26 = vector.load %arg5[%c0_9, %c0_10] : memref<32x96xbf16, #tpu.memory_space<vmem>>, vector<32x96xbf16>
    %cst_11 = arith.constant dense<0.000000e+00> : vector<16x96xf32>
    %27 = tpu.matmul %25, %26, %cst_11 {dimension_numbers = #tpu.dot_dimension_numbers<[1], [0], [0], [1], [0, 0, 1, 1], [], []>} : vector<16x32xbf16>, vector<32x96xbf16>, vector<16x96xf32> -> vector<16x96xf32>
    %c0_12 = arith.constant 0 : index
    %c0_13 = arith.constant 0 : index
    %28 = vector.load %arg6[%c0_12, %c0_13] : memref<1x96xf32, #tpu.memory_space<vmem>>, vector<1x96xf32>
    %29 = vector.broadcast %28 : vector<1x96xf32> to vector<16x96xf32>
    %30 = arith.addf %27, %29 : vector<16x96xf32>
    %31 = arith.truncf %30 : vector<16x96xf32> to vector<16x96xbf16>
    %c0_14 = arith.constant 0 : index
    %c0_15 = arith.constant 0 : index
    %32 = vector.load %arg7[%c0_14, %c0_15] : memref<16x96xbf16, #tpu.memory_space<vmem>>, vector<16x96xbf16>
    tpu.vector_store %arg7[%c0_14, %c0_15], %31 {strides = array<i32>} : memref<16x96xbf16, #tpu.memory_space<vmem>>, vector<16x96xbf16>,
    return
  }
  func.func @transform_0(%arg0: i32, %arg1: i32) -> (i32, i32) {
    %c0_i32 = arith.constant 0 : i32
    %c0_i32_0 = arith.constant 0 : i32
    return %arg0, %c0_i32 : i32, i32
  }
  func.func @transform_1(%arg0: i32, %arg1: i32) -> (i32, i32) {
    %c0_i32 = arith.constant 0 : i32
    %c0_i32_0 = arith.constant 0 : i32
    %c0_i32_1 = arith.constant 0 : i32
    return %c0_i32, %c0_i32_0 : i32, i32
  }
  func.func @transform_2(%arg0: i32, %arg1: i32) -> (i32, i32) {
    %c0_i32 = arith.constant 0 : i32
    %c0_i32_0 = arith.constant 0 : i32
    %c0_i32_1 = arith.constant 0 : i32
    return %c0_i32, %c0_i32_0 : i32, i32
  }
  func.func @transform_3(%arg0: i32, %arg1: i32) -> (i32, i32) {
    %c0_i32 = arith.constant 0 : i32
    %c0_i32_0 = arith.constant 0 : i32
    return %c0_i32, %arg1 : i32, i32
  }
  func.func @transform_4(%arg0: i32, %arg1: i32) -> (i32, i32) {
    %c0_i32 = arith.constant 0 : i32
    %c0_i32_0 = arith.constant 0 : i32
    return %c0_i32, %arg1 : i32, i32
  }
  func.func @transform_5(%arg0: i32, %arg1: i32) -> (i32, i32) {
    %c0_i32 = arith.constant 0 : i32
    return %arg0, %arg1 : i32, i32
  }
}

module attributes {stable_mosaic.version = 11 : i64} {
  func.func @_linear_residual_kernel(%arg0: i32, %arg1: i32, %arg2: memref<16x64xbf16, #tpu.memory_space<vmem>>, %arg3: memref<64x32xbf16, #tpu.memory_space<vmem>>, %arg4: memref<1x32xf32, #tpu.memory_space<vmem>>, %arg5: memref<16x32xf32, #tpu.memory_space<vmem>>, %arg6: memref<16x32xf32, #tpu.memory_space<vmem>>) attributes {dimension_semantics = [#tpu.dimension_semantics<parallel>, #tpu.dimension_semantics<parallel>], iteration_bounds = array<i64: 1, 1>, scalar_prefetch = 0 : i64, scratch_operands = 0 : i64, tpu.core_type = #tpu.core_type<tc>, window_params = [{transform_indices = @transform_0, window_bounds = array<i64: 16, 64>}, {transform_indices = @transform_1, window_bounds = array<i64: 64, 32>}, {transform_indices = @transform_2, window_bounds = array<i64: 1, 32>}, {transform_indices = @transform_3, window_bounds = array<i64: 16, 32>}, {transform_indices = @transform_4, window_bounds = array<i64: 16, 32>}]} {
    %c0 = arith.constant 0 : index
    %c0_0 = arith.constant 0 : index
    %0 = vector.load %arg2[%c0, %c0_0] : memref<16x64xbf16, #tpu.memory_space<vmem>>, vector<16x64xbf16>
    %c0_1 = arith.constant 0 : index
    %c0_2 = arith.constant 0 : index
    %1 = vector.load %arg3[%c0_1, %c0_2] : memref<64x32xbf16, #tpu.memory_space<vmem>>, vector<64x32xbf16>
    %cst = arith.constant dense<0.000000e+00> : vector<16x32xf32>
    %2 = tpu.matmul %0, %1, %cst {dimension_numbers = #tpu.dot_dimension_numbers<[1], [0], [0], [1], [0, 0, 1, 1], [], []>} : vector<16x64xbf16>, vector<64x32xbf16>, vector<16x32xf32> -> vector<16x32xf32>
    %c0_3 = arith.constant 0 : index
    %c0_4 = arith.constant 0 : index
    %3 = vector.load %arg4[%c0_3, %c0_4] : memref<1x32xf32, #tpu.memory_space<vmem>>, vector<1x32xf32>
    %4 = vector.broadcast %3 : vector<1x32xf32> to vector<16x32xf32>
    %5 = arith.addf %2, %4 : vector<16x32xf32>
    %c0_5 = arith.constant 0 : index
    %c0_6 = arith.constant 0 : index
    %6 = vector.load %arg5[%c0_5, %c0_6] : memref<16x32xf32, #tpu.memory_space<vmem>>, vector<16x32xf32>
    %7 = arith.addf %6, %5 : vector<16x32xf32>
    %c0_7 = arith.constant 0 : index
    %c0_8 = arith.constant 0 : index
    %8 = vector.load %arg6[%c0_7, %c0_8] : memref<16x32xf32, #tpu.memory_space<vmem>>, vector<16x32xf32>
    tpu.vector_store %arg6[%c0_7, %c0_8], %7 {strides = array<i32>} : memref<16x32xf32, #tpu.memory_space<vmem>>, vector<16x32xf32>,
    return
  }
  func.func @transform_0(%arg0: i32, %arg1: i32) -> (i32, i32) {
    %c0_i32 = arith.constant 0 : i32
    %c0_i32_0 = arith.constant 0 : i32
    return %arg0, %c0_i32 : i32, i32
  }
  func.func @transform_1(%arg0: i32, %arg1: i32) -> (i32, i32) {
    %c0_i32 = arith.constant 0 : i32
    %c0_i32_0 = arith.constant 0 : i32
    return %c0_i32, %arg1 : i32, i32
  }
  func.func @transform_2(%arg0: i32, %arg1: i32) -> (i32, i32) {
    %c0_i32 = arith.constant 0 : i32
    %c0_i32_0 = arith.constant 0 : i32
    return %c0_i32, %arg1 : i32, i32
  }
  func.func @transform_3(%arg0: i32, %arg1: i32) -> (i32, i32) {
    %c0_i32 = arith.constant 0 : i32
    return %arg0, %arg1 : i32, i32
  }
  func.func @transform_4(%arg0: i32, %arg1: i32) -> (i32, i32) {
    %c0_i32 = arith.constant 0 : i32
    return %arg0, %arg1 : i32, i32
  }
}

</mosaic_0001>

<bundles_post_ra>
// kernel: performer_forward.10
= control target key start
LH: loop header
LB: loop body
LE: loop exit
PB: predicated region body
PF: predicated region fallthrough
CT: control target
= control target key end

     0   :  { %10 = vsyncpa [#allocation3], 0  ;;  %s221_s18 = smov [#allocation2]   ;;  %s285_s0 = inlined_call_operand.hbm [shape: f32[16,32], index: 0, kind: input, shape index: {}]   ;;  %s286_s1 = inlined_call_operand.vmem [shape: f32[1,32], index: 1, kind: input, shape index: {}]   ;;  %s287_s2 = inlined_call_operand.vmem [shape: f32[1,32], index: 2, kind: input, shape index: {}]   ;;  %s288_s3 = inlined_call_operand.vmem [shape: bf16[32,96], index: 3, kind: input, shape index: {}]   ;;  %s289_s4 = inlined_call_operand.vmem [shape: f32[1,96], index: 4, kind: input, shape index: {}]   ;;  %s290_s5 = inlined_call_operand.vmem [shape: bf16[16,96], index: 5, kind: output, shape index: {}]  }
   0x1   :  { %s16_s19 = sshll.u32 %s221_s18, 4  ;;  %s17_s19 = int_to_ptr.vmem [resolvable:$true] %s16_s19 }
   0x2   :  { %s207_s20 = scalar_lea.vmem %s17_s19, 256  ;;  %p212_p1 = scmp.lt.s32.totalorder %s17_s19, %s17_s19 }
   0x3   :  { %p208_p0 = scmp.ne.s32.totalorder %s17_s19, %s207_s20  ;;  %p213_p2 = scmp.lt.s32.totalorder %s207_s20, %s207_s20 }
   0x5   :  { %p214_p3 = por %p213_p2, %p212_p1 }
   0x7   :  { %p215_p4 = pnand %p214_p3, %p208_p0 }
   0x9   :  { %218 = shalt.err (!%p215_p4)
}
   0xa   :  { %s222_s21 = smov 128   ;;  %s223_s22 = smov 8  }
   0xb   :  { %22 = dma.hbm_to_vmem [thread:$0]  %s285_s0, 256, %s17_s19, [#allocation3], %s222_s21, %s222_s21, %s223_s22  }
   0xc   :  { %219 = dma.done.wait [#allocation3], 256  }
   0xd   :  { %220 = vsyncadd [#allocation3], 4294967040  ;;  %vm39_vm0 = vcmask 261120   ;;  %v35_v0 = vld [vmem:[#allocation2] sm:$0xff]  ;;  %v36_v1 = vld [vmem:[#allocation2 + $0x8] sm:$0xff]  ;;  %v224_v15 = vmov 0.0  }
   0xe   :  { %v40_v2 = vsel %vm39_vm0, %v35_v0, 0.0  ;;  %v43_v3 = vsel %vm39_vm0, %v36_v1, 0.0  ;;  %v193_v14 = vld [vmem:[%s288_s3 + $0x8] sm:$0xff]   ;;  %180 = vmatprep.subr.bf16.mxu0 %v224_v15  ;;  %vm225_vm1 = vmmov 0   ;;  %v194_v16 = vld [vmem:[%s288_s3] sm:$0xff]   ;;  %vm159_vm2 = vcmask 781312  }
   0xf   :  { %41 = vadd.xlane.f32.xlu0 %v40_v2  ;;  %184 = vmatprep.mubr.msk.bf16.mxu0 %vm225_vm1, %v224_v15  ;;  %v167_v25 = vld [vmem:[%s286_s1] ss:$0 sm:$0xff] }
  0x10   :  { %181 = vmatpush3.bf16.msra.mxu0 %v193_v14  ;;  %v168_v29 = vld [vmem:[%s287_s2] ss:$0 sm:$0xff] }
  0x11   :  { %182 = vmatprep.subr.bf16.mxu0 %v224_v15  ;;  %v169_v34 = vld [vmem:[%s289_s4] ss:$0 sm:$0xff] }
  0x13   :  { %44 = vadd.xlane.f32.xlu0 %v43_v3 }
  0x14   :  { %183 = vmatpush3.bf16.msra.mxu0 %v194_v16 }
  0x98   :  { %v42_v4 = vpop.xlane.xlu0 %41 }
  0x99   :  { %v47_v5 = vmul.f32 0.03125, %v42_v4 }
  0x9b   :  { %v49_v6 = vsub.f32 %v35_v0, %v47_v5 }
  0x9c   :  { %v45_v7 = vpop.xlane.xlu0 %44 }
  0x9d   :  { %v48_v8 = vmul.f32 0.03125, %v45_v7  ;;  %v51_v9 = vmul.f32 %v49_v6, %v49_v6 }
  0x9f   :  { %v50_v10 = vsub.f32 %v36_v1, %v48_v8  ;;  %v53_v11 = vsel %vm39_vm0, %v51_v9, 0.0 }
  0xa0   :  { %54 = vadd.xlane.f32.xlu1 %v53_v11 }
  0xa1   :  { %v52_v12 = vmul.f32 %v50_v10, %v50_v10 }
  0xa3   :  { %v56_v13 = vsel %vm39_vm0, %v52_v12, 0.0 }
  0xa4   :  { %57 = vadd.xlane.f32.xlu1 %v56_v13 }
 0x129   :  { %v55_v17 = vpop.xlane.xlu1 %54 }
 0x12a   :  { %v59_v18 = vmul.f32 0.03125, %v55_v17 }
 0x12c   :  { %v61_v19 = vadd.f32 1e-05, %v59_v18 }
 0x12d   :  { %v58_v20 = vpop.xlane.xlu1 %57 }
 0x12e   :  { %195 = vrsqrt.f32 %v61_v19  ;;  %v60_v21 = vmul.f32 0.03125, %v58_v20 }
 0x130   :  { %v62_v22 = vadd.f32 1e-05, %v60_v21 }
 0x132   :  { %197 = vrsqrt.f32 %v62_v22 }
 0x13b   :  { %v196_v23 = vpop.eup %195 }
 0x13c   :  { %v65_v24 = vmul.f32 %v196_v23, %v49_v6 }
 0x13e   :  { %v73_v28 = vmul.f32 %v167_v25, %v65_v24 }
 0x13f   :  { %v198_v26 = vpop.eup %197 }
 0x140   :  { %v66_v27 = vmul.f32 %v198_v26, %v50_v10  ;;  %v81_v31 = vadd.f32 %v168_v29, %v73_v28 }
 0x142   :  { %v74_v30 = vmul.f32 %v167_v25, %v66_v27 }
 0x144   :  { %v82_v32 = vadd.f32 %v168_v29, %v74_v30 }
 0x146   :  { %v83_v33 = vpack.c.bf16 %v82_v32, %v81_v31 }
 0x148   :  { %185 = vmatmul.mubr.msk.bf16.vlgmr.msra.gmra.mxu0 %vm39_vm0, %v83_v33 }
 0x208   :  { %v144_v35 = vpop.f32.mrf.mxu0 }
 0x209   :  { %v145_v36 = vadd.f32 %v169_v34, %v144_v35 }
 0x20a   :  { %v186_v37 = vpop.f32.mrf.mxu0 }
 0x20b   :  { %v175_v38 = vpack.c.bf16 %v145_v36, %v145_v36 }
 0x20c   :  { %v147_v39 = vpop.f32.mrf.mxu0 }
 0x20d   :  { %160 = vst.msk [vmem:[%s290_s5] sm:$0xf] %vm159_vm2, %v175_v38  ;;  %v148_v40 = vadd.f32 %v169_v34, %v147_v39 }
 0x20e   :  { %v187_v41 = vpop.f32.mrf.mxu0 }
 0x20f   :  { %v176_v42 = vpack.c.bf16 %v148_v40, %v148_v40 }
 0x211   :  { %161 = vst.msk [vmem:[%s290_s5 + $0x4] sm:$0xf] %vm159_vm2, %v176_v42 }
 0x212   :  { %166 = vsyncpa [#allocation3], 1 }

// kernel: performer_forward.12
= control target key start
LH: loop header
LB: loop body
LE: loop exit
PB: predicated region body
PF: predicated region fallthrough
CT: control target
= control target key end

     0   :  { %v124_v0 = vmov 0.0   ;;  %vm125_vm0 = vmmov 0   ;;  %vm48_vm1 = vcmask 261120   ;;  %s178_s1 = inlined_call_operand.vmem [shape: bf16[32,32], index: 1, kind: input, shape index: {}]   ;;  %s179_s0 = inlined_call_operand.vmem [shape: bf16[16,32], index: 0, kind: input, shape index: {}]   ;;  %s180_s2 = inlined_call_operand.vmem [shape: f32[1,32], index: 2, kind: input, shape index: {}]   ;;  %s181_s3 = inlined_call_operand.vmem [shape: f32[16,32], index: 3, kind: input, shape index: {}]   ;;  %s182_s4 = inlined_call_operand.vmem [shape: f32[16,32], index: 4, kind: output, shape index: {}]  }
   0x1   :  { %111 = vmatprep.subr.bf16.mxu0 %v124_v0  ;;  %v121_v1 = vld [vmem:[%s178_s1 + $0x8] sm:$0xff]   ;;  %115 = vmatprep.mubr.msk.bf16.mxu0 %vm125_vm0, %v124_v0  ;;  %v122_v2 = vld [vmem:[%s178_s1] sm:$0xff]  }
   0x2   :  { %112 = vmatpush3.bf16.msra.mxu0 %v121_v1  ;;  %v123_v3 = vld [vmem:[%s179_s0] sm:$0xff]   ;;  %v94_v11 = vld [vmem:[%s181_s3 + $0x8] sm:$0xff] }
   0x3   :  { %113 = vmatprep.subr.bf16.mxu0 %v124_v0  ;;  %v103_v4 = vld [vmem:[%s180_s2] ss:$0 sm:$0xff] }
   0x4   :  { %v93_v6 = vld [vmem:[%s181_s3] sm:$0xff] }
   0x6   :  { %114 = vmatpush3.bf16.msra.mxu0 %v122_v2 }
   0x9   :  { %116 = vmatmul.mubr.msk.bf16.vlgmr.msra.gmra.mxu0 %vm48_vm1, %v123_v3 }
  0xc9   :  { %v86_v5 = vpop.f32.mrf.mxu0 }
  0xca   :  { %v87_v7 = vadd.f32 %v103_v4, %v86_v5 }
  0xcb   :  { %v117_v8 = vpop.f32.mrf.mxu0 }
  0xcc   :  { %v95_v9 = vadd.f32 %v93_v6, %v87_v7 }
  0xcd   :  { %v89_v10 = vpop.f32.mrf.mxu0 }
  0xce   :  { %97 = vst.msk [vmem:[%s182_s4] sm:$0xff] %vm48_vm1, %v95_v9  ;;  %v90_v12 = vadd.f32 %v103_v4, %v89_v10 }
  0xcf   :  { %v118_v13 = vpop.f32.mrf.mxu0 }
  0xd0   :  { %v96_v14 = vadd.f32 %v94_v11, %v90_v12 }
  0xd2   :  { %98 = vst.msk [vmem:[%s182_s4 + $0x8] sm:$0xff] %vm48_vm1, %v96_v14 }

// kernel: performer_forward.13
= control target key start
LH: loop header
LB: loop body
LE: loop exit
PB: predicated region body
PF: predicated region fallthrough
CT: control target
= control target key end

     0   :  { %vm25_vm0 = vcmask 261120   ;;  %v203_v14 = vmov 0.0   ;;  %vm204_vm1 = vmmov 0   ;;  %vm163_vm2 = vcmask 519168   ;;  %s267_s0 = inlined_call_operand.vmem [shape: f32[16,32], index: 0, kind: input, shape index: {}]   ;;  %s268_s3 = inlined_call_operand.vmem [shape: bf16[32,64], index: 3, kind: input, shape index: {}]   ;;  %s269_s1 = inlined_call_operand.vmem [shape: f32[1,32], index: 1, kind: input, shape index: {}]   ;;  %s270_s2 = inlined_call_operand.vmem [shape: f32[1,32], index: 2, kind: input, shape index: {}]   ;;  %s271_s4 = inlined_call_operand.vmem [shape: f32[1,64], index: 4, kind: input, shape index: {}]   ;;  %s272_s5 = inlined_call_operand.vmem [shape: bf16[16,64], index: 5, kind: output, shape index: {}]  }
   0x1   :  { %v21_v0 = vld [vmem:[%s267_s0] sm:$0xff]  ;;  %v22_v1 = vld [vmem:[%s267_s0 + $0x8] sm:$0xff]  ;;  %183 = vmatprep.subr.bf16.mxu0 %v203_v14  ;;  %187 = vmatprep.mubr.msk.bf16.mxu0 %vm204_vm1, %v203_v14 }
   0x2   :  { %v26_v2 = vsel %vm25_vm0, %v21_v0, 0.0  ;;  %v29_v3 = vsel %vm25_vm0, %v22_v1, 0.0  ;;  %v193_v15 = vld [vmem:[%s268_s3 + $0x8] sm:$0xff]   ;;  %v194_v16 = vld [vmem:[%s268_s3] sm:$0xff]  }
   0x3   :  { %27 = vadd.xlane.f32.xlu0 %v26_v2  ;;  %184 = vmatpush3.bf16.msra.mxu0 %v193_v15  ;;  %v170_v25 = vld [vmem:[%s269_s1] ss:$0 sm:$0xff] }
   0x4   :  { %185 = vmatprep.subr.bf16.mxu0 %v203_v14  ;;  %v171_v29 = vld [vmem:[%s270_s2] ss:$0 sm:$0xff] }
   0x5   :  { %v172_v34 = vld [vmem:[%s271_s4] ss:$0 sm:$0xff] }
   0x7   :  { %30 = vadd.xlane.f32.xlu0 %v29_v3  ;;  %186 = vmatpush3.bf16.msra.mxu0 %v194_v16 }
  0x8c   :  { %v28_v4 = vpop.xlane.xlu0 %27 }
  0x8d   :  { %v33_v5 = vmul.f32 0.03125, %v28_v4 }
  0x8f   :  { %v35_v6 = vsub.f32 %v21_v0, %v33_v5 }
  0x90   :  { %v31_v7 = vpop.xlane.xlu0 %30 }
  0x91   :  { %v34_v8 = vmul.f32 0.03125, %v31_v7  ;;  %v37_v9 = vmul.f32 %v35_v6, %v35_v6 }
  0x93   :  { %v36_v10 = vsub.f32 %v22_v1, %v34_v8  ;;  %v39_v11 = vsel %vm25_vm0, %v37_v9, 0.0 }
  0x94   :  { %40 = vadd.xlane.f32.xlu1 %v39_v11 }
  0x95   :  { %v38_v12 = vmul.f32 %v36_v10, %v36_v10 }
  0x97   :  { %v42_v13 = vsel %vm25_vm0, %v38_v12, 0.0 }
  0x98   :  { %43 = vadd.xlane.f32.xlu1 %v42_v13 }
 0x11d   :  { %v41_v17 = vpop.xlane.xlu1 %40 }
 0x11e   :  { %v45_v18 = vmul.f32 0.03125, %v41_v17 }
 0x120   :  { %v47_v19 = vadd.f32 1e-05, %v45_v18 }
 0x121   :  { %v44_v20 = vpop.xlane.xlu1 %43 }
 0x122   :  { %195 = vrsqrt.f32 %v47_v19  ;;  %v46_v21 = vmul.f32 0.03125, %v44_v20 }
 0x124   :  { %v48_v22 = vadd.f32 1e-05, %v46_v21 }
 0x126   :  { %197 = vrsqrt.f32 %v48_v22 }
 0x12f   :  { %v196_v23 = vpop.eup %195 }
 0x130   :  { %v51_v24 = vmul.f32 %v196_v23, %v35_v6 }
 0x132   :  { %v59_v28 = vmul.f32 %v170_v25, %v51_v24 }
 0x133   :  { %v198_v26 = vpop.eup %197 }
 0x134   :  { %v52_v27 = vmul.f32 %v198_v26, %v36_v10  ;;  %v67_v31 = vadd.f32 %v171_v29, %v59_v28 }
 0x136   :  { %v60_v30 = vmul.f32 %v170_v25, %v52_v27 }
 0x138   :  { %v68_v32 = vadd.f32 %v171_v29, %v60_v30 }
 0x13a   :  { %v69_v33 = vpack.c.bf16 %v68_v32, %v67_v31 }
 0x13c   :  { %188 = vmatmul.mubr.msk.bf16.vlgmr.msra.gmra.mxu0 %vm25_vm0, %v69_v33 }
 0x1fc   :  { %v130_v35 = vpop.f32.mrf.mxu0 }
 0x1fd   :  { %v131_v36 = vadd.f32 %v172_v34, %v130_v35 }
 0x1fe   :  { %v189_v37 = vpop.f32.mrf.mxu0 }
 0x1ff   :  { %v139_v38 = vmul.f32 0.044715, %v131_v36  ;;  %v137_v52 = vmul.f32 0.5, %v131_v36 }
 0x200   :  { %v133_v39 = vpop.f32.mrf.mxu0 }
 0x201   :  { %v141_v40 = vmul.f32 %v139_v38, %v131_v36  ;;  %v134_v41 = vadd.f32 %v172_v34, %v133_v39 }
 0x202   :  { %v190_v42 = vpop.f32.mrf.mxu0 }
 0x203   :  { %v143_v43 = vmul.f32 %v141_v40, %v131_v36  ;;  %v140_v44 = vmul.f32 0.044715, %v134_v41  ;;  %v138_v57 = vmul.f32 0.5, %v134_v41 }
 0x205   :  { %v145_v45 = vadd.f32 %v143_v43, %v131_v36  ;;  %v142_v46 = vmul.f32 %v140_v44, %v134_v41 }
 0x207   :  { %v147_v47 = vmul.f32 0.7978846, %v145_v45  ;;  %v144_v48 = vmul.f32 %v142_v46, %v134_v41 }
 0x209   :  { %199 = vtanh.f32 %v147_v47  ;;  %v146_v49 = vadd.f32 %v144_v48, %v134_v41 }
 0x20b   :  { %v148_v50 = vmul.f32 0.7978846, %v146_v49 }
 0x20d   :  { %201 = vtanh.f32 %v148_v50 }
 0x216   :  { %v200_v51 = vpop.eup %199 }
 0x217   :  { %v151_v53 = vadd.f32 1.0, %v200_v51 }
 0x219   :  { %v153_v54 = vmul.f32 %v151_v53, %v137_v52 }
 0x21a   :  { %v202_v55 = vpop.eup %201 }
 0x21b   :  { %v178_v56 = vpack.c.bf16 %v153_v54, %v153_v54  ;;  %v152_v58 = vadd.f32 1.0, %v202_v55 }
 0x21d   :  { %164 = vst.msk [vmem:[%s272_s5] sm:$0xf] %vm163_vm2, %v178_v56  ;;  %v154_v59 = vmul.f32 %v152_v58, %v138_v57 }
 0x21f   :  { %v179_v60 = vpack.c.bf16 %v154_v59, %v154_v59 }
 0x221   :  { %165 = vst.msk [vmem:[%s272_s5 + $0x4] sm:$0xf] %vm163_vm2, %v179_v60 }

// kernel: performer_forward.11
= control target key start
LH: loop header
LB: loop body
LE: loop exit
PB: predicated region body
PF: predicated region fallthrough
CT: control target
= control target key end

     0   :  { %s1746_s15 = smov 0   ;;  %s1748_s16 = smov 0   ;;  %s1954_s0 = inlined_call_operand.vmem [shape: bf16[2,8,32], index: 0, kind: input, shape index: {}]   ;;  %s1955_s1 = inlined_call_operand.vmem [shape: bf16[2,8,32], index: 1, kind: input, shape index: {}]   ;;  %s1956_s2 = inlined_call_operand.vmem [shape: bf16[2,8,32], index: 2, kind: input, shape index: {}]   ;;  %s1957_s3 = inlined_call_operand.vmem [shape: bf16[8,16], index: 3, kind: input, shape index: {}]   ;;  %s1958_s4 = inlined_call_operand.vmem [shape: bf16[2,8,32], index: 4, kind: output, shape index: {}]  }
   0x1   :  { %s1750_s17 = smov 0  }
   0x2 LB: > { %s26_s18 = sadd.s32 1, %s1707_s16  ;;  %p1449_p0 = scmp.ge.s32.totalorder %s1711_s17, 1  ;;  %s1711_s17 = sphi %s1750_s17, %s14_s17   ;;  %s1707_s16 = sphi %s1748_s16, %s1960_s16   ;;  %s1703_s15 = sphi %s1746_s15, %s1959_s15  }
   0x3   : > { %p28_p1 = scmp.ge.s32.totalorder %s26_s18, 2  ;;  %p193_p2 = scmp.lt.s32.totalorder %s1711_s17, 3 }
   0x5   : > { %s1962_s18 = smov (%p28_p1, %s26_s18), 0  ;;  %p194_p3 = pnand %p1449_p0, %p193_p2 }
   0x6   : > { %p228_p4 = scmp.lt.s32.totalorder (!%p194_p3), %s1703_s15, 1  ;;  %s1715_s6 = smov (!%p194_p3), 120  }
   0x7   : > { %197 = sbr.rel (%p194_p3) target bundleno = 3234 (0xca2), region = 36  ;;  %s1716_s8 = smov (!%p194_p3), 112  }
   0x8   : > { %s1717_s10 = smov (!%p194_p3), 104   ;;  %s1718_s12 = smov (!%p194_p3), 16  }
   0x9   : > { %s1719_s19 = smov (!%p194_p3), 8   ;;  %s1720_s20 = smov (!%p194_p3), 24  }
   0xc   : > { %v248_v0 = vld [vmem:[%s1957_s3] sm:$0xf]  ;;  %vm258_vm0 = vcmask 1043456   ;;  %v1713_v1 = vmov 0.0   ;;  %vm1714_vm1 = vmmov 0   ;;  %s1964_s15 = smov (!%p228_p4, %s1703_s15), 1 }
   0xd   : > { %1525 = vmatprep.subr.bf16.mxu1 %v1713_v1  ;;  %v1769_v2 = vsel %vm258_vm0, %v248_v0, 0  ;;  %1527 = vmatprep.mubr.msk.bf16.mxu1 %vm1714_vm1, %v1713_v1  ;;  %s1778_s21 = sshll.u32 %s1964_s15, 2  ;;  %vm254_vm2 = vcmask 64512   ;;  %vm356_vm3 = vcmask 130048   ;;  %vm505_vm4 = vcmask 60416  }
   0xe   : > { %1526 = vmatpush3.bf16.msra.mxu1 %v1769_v2  ;;  %1519 = vmatprep.subr.bf16.mxu0 %v1713_v1  ;;  %s1786_s24 = scalar_lea.vmem %s1955_s1, %s1778_s21  ;;  %s1796_s27 = scalar_lea.vmem %s1954_s0, %s1778_s21  ;;  %vm786_vm5 = vcmask 126016   ;;  %vm1067_vm6 = vcmask 191616   ;;  %vm1348_vm7 = vcmask 257216  }
   0xf   : > { %1520 = vmatpush3.bf16.msra.mxu0 %v1769_v2  ;;  %1521 = vmatprep.mubr.msk.bf16.mxu0 %vm1714_vm1, %v1713_v1  ;;  %v250_v3 = vld [vmem:[%s1786_s24] sm:$0xf]  ;;  %s1808_s30 = scalar_lea.vmem %s1956_s2, %s1778_s21  ;;  %s1937_s15 = scalar_lea.vmem %s1958_s4, %s1778_s21 }
  0x10   : > { %1531 = vmatprep.subr.bf16.mxu0 %v1713_v1  ;;  %1537 = vmatprep.subr.bf16.mxu1 %v1713_v1  ;;  %v249_v4 = vld [vmem:[%s1796_s27] sm:$0xf]  ;;  %v253_v5 = vunpack.c.l.bf16 %v250_v3 }
  0x11   : > { %1528 = vmatmul.mubr.msk.bf16.vlgmr.msra.gmra.mxu1 %vm254_vm2, %v250_v3  ;;  %v251_v15 = vld [vmem:[%s1808_s30] sm:$0xf]  ;;  %v252_v37 = vunpack.c.l.bf16 %v249_v4 }
  0x12   : > { %1539 = vmatprep.mubr.msk.bf16.mxu1 %vm1714_vm1, %v1713_v1  ;;  %1522 = vmatmul.mubr.msk.bf16.vlgmr.msra.gmra.mxu0 %vm254_vm2, %v249_v4  ;;  %v350_v6 = vmul.f32 %v253_v5, %v253_v5  ;;  %v415_v16 = vsel %vm258_vm0, %v251_v15, 0  ;;  %v508_v40 = vld [vmem:[%s1786_s24] sm:$0xf] }
  0x13   : > { %1533 = vmatprep.mubr.msk.bf16.mxu0 %vm1714_vm1, %v1713_v1  ;;  %1532 = vmatpush3.bf16.msra.mxu0 %v415_v16  ;;  %v345_v38 = vmul.f32 %v252_v37, %v252_v37  ;;  %v1460_v41 = vcombine.low %v508_v40, %v508_v40  ;;  %v511_v42 = vunpack.c.l.bf16 %v508_v40  ;;  %v507_v62 = vld [vmem:[%s1796_s27] sm:$0xf] }
  0x14   : > { %v351_v10 = vsel %vm254_vm2, %v350_v6, 0.0  ;;  %1543 = vmatprep.subr.bf16.mxu0 %v1713_v1  ;;  %v1458_v63 = vcombine.low %v507_v62, %v507_v62 }
  0x15   : > { %v346_v39 = vsel %vm254_vm2, %v345_v38, 0.0  ;;  %v617_v43 = vmul.f32 %v511_v42, %v511_v42 }
  0xd1   : > { %v339_v7 = vpop.f32.mrf.mxu1 }
  0xd2   : > { %v366_v8 = vsel %vm356_vm3, %v339_v7, -inf  ;;  %v296_v13 = vpop.f32.mrf.mxu0 }
  0xd3   : > { %367 = vmax.xlane.f32.xlu0 %v366_v8  ;;  %v1529_v9 = vpop.f32.mrf.mxu1  ;;  %v357_v14 = vsel %vm356_vm3, %v296_v13, -inf }
  0xd4   : > { %v1523_v17 = vpop.f32.mrf.mxu0 }
  0xd5   : > { %v342_v11 = vpop.f32.mrf.mxu1 }
  0xd6   : > { %v299_v18 = vpop.f32.mrf.mxu0 }
  0xd7   : > { %v1530_v12 = vpop.f32.mrf.mxu1  ;;  %352 = vadd.xlane.f32.xlu0 %v351_v10 }
  0xd8   : > { %v1524_v19 = vpop.f32.mrf.mxu0 }
  0xdb   : > { %358 = vmax.xlane.f32.xlu0 %v357_v14 }
  0xf1   : > { %563 = vrot.lane.b32.xlu0 %v1460_v41, %s1715_s6 }
 0x15c   : > { %v368_v20 = vpop.xlane.xlu0 %367 }
 0x15d   : > { %v369_v21 = vrot.slane %v368_v20, 4 }
 0x15f   : > { %v370_v22 = vmax.f32 %v368_v20, %v369_v21  ;;  %v1658_v21 = vld [vmem:[%s1808_s30] ss:$0 sps:$4 sm:$0xff]  }
 0x160   : > { %v353_v27 = vpop.xlane.xlu0 %352 }
 0x161   : > { %v371_v23 = vrot.slane %v370_v22, 2  ;;  %v354_v28 = vmul.f32 0.17677669, %v353_v27 }
 0x163   : > { %v372_v24 = vmax.f32 %v370_v22, %v371_v23  ;;  %v365_v29 = vsub.f32 %v339_v7, %v354_v28  ;;  %v510_v22 = vunpack.c.l.bf16 %v507_v62 }
 0x164   : > { %v359_v48 = vpop.xlane.xlu0 %358 }
 0x165   : > { %v373_v25 = vrot.slane %v372_v24, 1  ;;  %v608_v23 = vmul.f32 %v510_v22, %v510_v22 }
 0x167   : > { %v374_v26 = vmax.f32 %v372_v24, %v373_v25 }
 0x168   : > { %v564_v10 = vpop.permute.xlu0 %563 }
 0x169   : > { %1615 = vpush %v374_v26 }
 0x19a   : > { %s1616_s5 = spop %1615 }
 0x19b   : > { %v376_v30 = vstv %s1616_s5 }
 0x19c   : > { %v377_v31 = vsub.f32 %v365_v29, %v376_v30 }
 0x19e   : > { %v378_v32 = vmul.f32 1.442695, %v377_v31 }
 0x1a0   : > { %1665 = vpow2.f32 %v378_v32 }
 0x1ad   : > { %v1666_v33 = vpop.eup %1665 }
 0x1ae   : > { %v380_v34 = vadd.f32 0.0001, %v1666_v33 }
 0x1b0   : > { %v381_v35 = vmul.f32 0.25, %v380_v34 }
 0x1b2   : > { %v394_v36 = vpack.c.bf16 %v381_v35, %v381_v35  ;;  %v382_v47 = vsel %vm356_vm3, %v381_v35, 0.0 }
 0x1b3   : > { %v383_v50 = vrot.slane %v382_v47, 4 }
 0x1b4   : > { %395 = vxpose.xlu1.c.b16.start.end [1/1] (short) (narrow) %v394_v36, 16 }
 0x1b5   : > { %v384_v53 = vadd.f32 %v383_v50, %v382_v47  ;;  %v789_v50 = vld [vmem:[%s1786_s24] sm:$0xf] }
 0x1b7   : > { %v385_v54 = vrot.slane %v384_v53, 2 }
 0x1b9   : > { %v386_v55 = vadd.f32 %v385_v54, %v384_v53 }
 0x1bb   : > { %v387_v56 = vrot.slane %v386_v55, 1 }
 0x1bd   : > { %v388_v60 = vadd.f32 %v387_v56, %v386_v55 }
 0x1c1   : > { %347 = vadd.xlane.f32.xlu1 %v346_v39 }
 0x1d2   : > { %619 = vrot.lane.b32.xlu1 %v617_v43, %s1715_s6 }
 0x1d6   : > { %515 = vrot.lane.b32.xlu1 %v1458_v63, %s1715_s6 }
 0x216   : > { %v403_v44 = vpop.trf.xlu1 }
 0x217   : > { %1534 = vmatmul.mubr.msk.bf16.vlgmr.msra.gmra.mxu0 %vm254_vm2, %v403_v44 }
 0x218   : > { %1544 = vmatpush3.bf16.msra.mxu0 %v1769_v2  ;;  %1545 = vmatprep.mubr.msk.bf16.mxu0 %vm1714_vm1, %v1713_v1 }
 0x219   : > { %1555 = vmatprep.subr.bf16.mxu0 %v1713_v1 }
 0x24a   : > { %v348_v45 = vpop.xlane.xlu1 %347 }
 0x24b   : > { %v349_v46 = vmul.f32 0.17677669, %v348_v45 }
 0x24d   : > { %v355_v49 = vsub.f32 %v296_v13, %v349_v46 }
 0x24e   : > { %v620_v0 = vpop.permute.xlu1 %619 }
 0x24f   : > { %v360_v51 = vsub.f32 %v355_v49, %v359_v48  ;;  %v622_v3 = vsel %vm254_vm2, %v620_v0, 0.0 }
 0x250   : > { %623 = vadd.xlane.f32.xlu1 %v622_v3 }
 0x251   : > { %v361_v52 = vmul.f32 1.442695, %v360_v51  ;;  %v1468_v51 = vcombine.low %v789_v50, %v789_v50 }
 0x252   : > { %v516_v11 = vpop.permute.xlu1 %515 }
 0x253   : > { %1667 = vpow2.f32 %v361_v52  ;;  %1546 = vmatmul.mubr.msk.bf16.vlgmr.msra.gmra.mxu0 %vm254_vm2, %v516_v11  ;;  %v792_v52 = vunpack.c.l.bf16 %v789_v50  ;;  %v788_v11 = vld [vmem:[%s1796_s27] sm:$0xf] }
 0x254   : > { %1557 = vmatprep.mubr.msk.bf16.mxu0 %vm1714_vm1, %v1713_v1 }
 0x255   : > { %v898_v53 = vmul.f32 %v792_v52, %v792_v52 }
 0x260   : > { %v1668_v57 = vpop.eup %1667 }
 0x261   : > { %v363_v58 = vadd.f32 0.0001, %v1668_v57 }
 0x263   : > { %v364_v59 = vmul.f32 0.25, %v363_v58 }
 0x265   : > { %v1824_v61 = vmul.f32 %v388_v60, %v364_v59  ;;  %v458_v9 = vpack.c.bf16 %v364_v59, %v364_v59 }
 0x2d7   : > { %v451_v4 = vpop.f32.mrf.mxu0 }
 0x2d9   : > { %v1535_v5 = vpop.f32.mrf.mxu0  ;;  %v624_v39 = vpop.xlane.xlu1 %623 }
 0x2da   : > { %v625_v40 = vmul.f32 0.17677669, %v624_v39 }
 0x2db   : > { %v454_v6 = vpop.f32.mrf.mxu0 }
 0x2dc   : > { %v459_v7 = vpack.c.bf16 %v454_v6, %v451_v4 }
 0x2dd   : > { %v1536_v8 = vpop.f32.mrf.mxu0 }
 0x2de   : > { %1538 = vmatpush3.bf16.msra.mxu1 %v459_v7 }
 0x2df   : > { %1549 = vmatprep.subr.bf16.mxu1 %v1713_v1 }
 0x2e1   : > { %1540 = vmatmul.mubr.msk.bf16.vlgmr.msra.gmra.mxu1 %vm356_vm3, %v458_v9 }
 0x2e2   : > { %1550 = vmatpush3.bf16.msra.mxu1 %v1769_v2  ;;  %1551 = vmatprep.mubr.msk.bf16.mxu1 %vm1714_vm1, %v1713_v1 }
 0x2e3   : > { %1561 = vmatprep.subr.bf16.mxu1 %v1713_v1 }
 0x2e9   : > { %1552 = vmatmul.mubr.msk.bf16.vlgmr.msra.gmra.mxu1 %vm254_vm2, %v564_v10 }
 0x2ea   : > { %1563 = vmatprep.mubr.msk.bf16.mxu1 %vm1714_vm1, %v1713_v1 }
 0x313   : > { %v554_v24 = vpop.f32.mrf.mxu0 }
 0x314   : > { %v627_v49 = vsel %vm356_vm3, %v554_v24, -inf }
 0x315   : > { %v1547_v25 = vpop.f32.mrf.mxu0 }
 0x317   : > { %v557_v26 = vpop.f32.mrf.mxu0 }
 0x319   : > { %v1548_v27 = vpop.f32.mrf.mxu0 }
 0x3a1   : > { %v1841_v12 = vpop.f32.mrf.mxu1 }
 0x3a3   : > { %v1541_v13 = vpop.f32.mrf.mxu1 }
 0x3a4   : > { %v1466_v13 = vcombine.low %v788_v11, %v788_v11 }
 0x3a5   : > { %v500_v14 = vpop.f32.mrf.mxu1 }
 0x3a7   : > { %v1542_v15 = vpop.f32.mrf.mxu1 }
 0x3a9   : > { %v602_v16 = vpop.f32.mrf.mxu1 }
 0x3aa   : > { %v636_v17 = vsel %vm356_vm3, %v602_v16, -inf  ;;  %v635_v41 = vsub.f32 %v602_v16, %v625_v40 }
 0x3ab   : > { %637 = vmax.xlane.f32.xlu0 %v636_v17  ;;  %v1553_v18 = vpop.f32.mrf.mxu1 }
 0x3ad   : > { %v605_v19 = vpop.f32.mrf.mxu1 }
 0x3af   : > { %v1554_v20 = vpop.f32.mrf.mxu1 }
 0x3c1   : > { %684 = vrot.lane.b32.xlu0 %v1658_v21, %s1715_s6 }
 0x3c5   : > { %610 = vrot.lane.b32.xlu0 %v608_v23, %s1715_s6 }
 0x434   : > { %v638_v28 = vpop.xlane.xlu0 %637 }
 0x435   : > { %v639_v29 = vrot.slane %v638_v28, 4 }
 0x437   : > { %v640_v30 = vmax.f32 %v638_v28, %v639_v29 }
 0x438   : > { %v685_v31 = vpop.permute.xlu0 %684 }
 0x439   : > { %v641_v32 = vrot.slane %v640_v30, 2  ;;  %v690_v33 = vsel %vm258_vm0, %v685_v31, 0 }
 0x43a   : > { %1556 = vmatpush3.bf16.msra.mxu0 %v690_v33  ;;  %v1661_v33 = vld [vmem:[%s1808_s30] ss:$0 sps:$4 sm:$0xff]  }
 0x43b   : > { %v642_v34 = vmax.f32 %v640_v30, %v641_v32  ;;  %1567 = vmatprep.subr.bf16.mxu0 %v1713_v1 }
 0x43c   : > { %v611_v35 = vpop.permute.xlu0 %610 }
 0x43d   : > { %v643_v36 = vrot.slane %v642_v34, 1  ;;  %v613_v37 = vsel %vm254_vm2, %v611_v35, 0.0 }
 0x43e   : > { %614 = vadd.xlane.f32.xlu0 %v613_v37 }
 0x43f   : > { %v644_v38 = vmax.f32 %v642_v34, %v643_v36  ;;  %v791_v34 = vunpack.c.l.bf16 %v788_v11 }
 0x441   : > { %1617 = vpush %v644_v38  ;;  %v889_v37 = vmul.f32 %v791_v34, %v791_v34 }
 0x454   : > { %844 = vrot.lane.b32.xlu0 %v1468_v51, %s1716_s8 }
 0x472   : > { %s1618_s7 = spop %1617 }
 0x473   : > { %v646_v42 = vstv %s1618_s7 }
 0x474   : > { %v647_v43 = vsub.f32 %v635_v41, %v646_v42 }
 0x476   : > { %v648_v44 = vmul.f32 1.442695, %v647_v43 }
 0x478   : > { %1669 = vpow2.f32 %v648_v44 }
 0x485   : > { %v1670_v45 = vpop.eup %1669 }
 0x486   : > { %v650_v46 = vadd.f32 0.0001, %v1670_v45 }
 0x488   : > { %v651_v47 = vmul.f32 0.25, %v650_v46 }
 0x48a   : > { %v664_v48 = vpack.c.bf16 %v651_v47, %v651_v47  ;;  %v652_v57 = vsel %vm356_vm3, %v651_v47, 0.0 }
 0x48b   : > { %v653_v60 = vrot.slane %v652_v57, 4 }
 0x48c   : > { %665 = vxpose.xlu1.c.b16.start.end [1/1] (short) (narrow) %v664_v48, 16 }
 0x48d   : > { %v654_v0 = vadd.f32 %v653_v60, %v652_v57 }
 0x48f   : > { %v655_v3 = vrot.slane %v654_v0, 2 }
 0x491   : > { %v656_v4 = vadd.f32 %v655_v3, %v654_v0 }
 0x493   : > { %v657_v5 = vrot.slane %v656_v4, 1 }
 0x495   : > { %v658_v9 = vadd.f32 %v657_v5, %v656_v4 }
 0x499   : > { %628 = vmax.xlane.f32.xlu1 %v627_v49 }
 0x4aa   : > { %900 = vrot.lane.b32.xlu1 %v898_v53, %s1716_s8 }
 0x4ae   : > { %796 = vrot.lane.b32.xlu1 %v1466_v13, %s1716_s8 }
 0x4c7   : > { %v615_v55 = vpop.xlane.xlu0 %614 }
 0x4c8   : > { %v616_v56 = vmul.f32 0.17677669, %v615_v55 }
 0x4ca   : > { %v626_v58 = vsub.f32 %v554_v24, %v616_v56 }
 0x4cb   : > { %v845_v23 = vpop.permute.xlu0 %844 }
 0x4ee   : > { %v673_v54 = vpop.trf.xlu1 }
 0x4ef   : > { %1558 = vmatmul.mubr.msk.bf16.vlgmr.msra.gmra.mxu0 %vm254_vm2, %v673_v54  ;;  %v1070_v54 = vld [vmem:[%s1786_s24] sm:$0xf] }
 0x4f0   : > { %1568 = vmatpush3.bf16.msra.mxu0 %v1769_v2  ;;  %1569 = vmatprep.mubr.msk.bf16.mxu0 %vm1714_vm1, %v1713_v1  ;;  %v1073_v55 = vunpack.c.l.bf16 %v1070_v54  ;;  %v1476_v4 = vcombine.low %v1070_v54, %v1070_v54 }
 0x4f1   : > { %1579 = vmatprep.subr.bf16.mxu0 %v1713_v1 }
 0x4f2   : > { %v1179_v57 = vmul.f32 %v1073_v55, %v1073_v55 }
 0x522   : > { %v629_v59 = vpop.xlane.xlu1 %628 }
 0x523   : > { %v630_v62 = vsub.f32 %v626_v58, %v629_v59 }
 0x525   : > { %v631_v63 = vmul.f32 1.442695, %v630_v62 }
 0x526   : > { %v901_v14 = vpop.permute.xlu1 %900 }
 0x527   : > { %1671 = vpow2.f32 %v631_v63  ;;  %v903_v15 = vsel %vm254_vm2, %v901_v14, 0.0 }
 0x528   : > { %904 = vadd.xlane.f32.xlu1 %v903_v15 }
 0x52a   : > { %v797_v21 = vpop.permute.xlu1 %796 }
 0x52b   : > { %1570 = vmatmul.mubr.msk.bf16.vlgmr.msra.gmra.mxu0 %vm254_vm2, %v797_v21 }
 0x52c   : > { %1581 = vmatprep.mubr.msk.bf16.mxu0 %vm1714_vm1, %v1713_v1 }
 0x534   : > { %v1672_v6 = vpop.eup %1671 }
 0x535   : > { %v633_v7 = vadd.f32 0.0001, %v1672_v6 }
 0x537   : > { %v634_v8 = vmul.f32 0.25, %v633_v7 }
 0x539   : > { %v1860_v10 = vmul.f32 %v658_v9, %v634_v8  ;;  %v733_v22 = vpack.c.bf16 %v634_v8, %v634_v8 }
 0x5af   : > { %v726_v16 = vpop.f32.mrf.mxu0 }
 0x5b1   : > { %v1559_v17 = vpop.f32.mrf.mxu0  ;;  %v905_v52 = vpop.xlane.xlu1 %904 }
 0x5b2   : > { %v906_v53 = vmul.f32 0.17677669, %v905_v52 }
 0x5b3   : > { %v729_v18 = vpop.f32.mrf.mxu0 }
 0x5b4   : > { %v734_v19 = vpack.c.bf16 %v729_v18, %v726_v16 }
 0x5b5   : > { %v1560_v20 = vpop.f32.mrf.mxu0 }
 0x5b6   : > { %1562 = vmatpush3.bf16.msra.mxu1 %v734_v19 }
 0x5b7   : > { %1573 = vmatprep.subr.bf16.mxu1 %v1713_v1 }
 0x5b9   : > { %1564 = vmatmul.mubr.msk.bf16.vlgmr.msra.gmra.mxu1 %vm356_vm3, %v733_v22 }
 0x5ba   : > { %1574 = vmatpush3.bf16.msra.mxu1 %v1769_v2  ;;  %1575 = vmatprep.mubr.msk.bf16.mxu1 %vm1714_vm1, %v1713_v1 }
 0x5bb   : > { %1585 = vmatprep.subr.bf16.mxu1 %v1713_v1 }
 0x5c1   : > { %1576 = vmatmul.mubr.msk.bf16.vlgmr.msra.gmra.mxu1 %vm254_vm2, %v845_v23 }
 0x5c2   : > { %1587 = vmatprep.mubr.msk.bf16.mxu1 %vm1714_vm1, %v1713_v1 }
 0x5eb   : > { %v835_v35 = vpop.f32.mrf.mxu0 }
 0x5ec   : > { %v908_v51 = vsel %vm356_vm3, %v835_v35, -inf }
 0x5ed   : > { %v1571_v36 = vpop.f32.mrf.mxu0 }
 0x5ef   : > { %v838_v38 = vpop.f32.mrf.mxu0 }
 0x5f1   : > { %v1572_v39 = vpop.f32.mrf.mxu0 }
 0x679   : > { %v1877_v24 = vpop.f32.mrf.mxu1 }
 0x67b   : > { %v1565_v25 = vpop.f32.mrf.mxu1 }
 0x67d   : > { %v775_v26 = vpop.f32.mrf.mxu1 }
 0x67e   : > { %v1069_v26 = vld [vmem:[%s1796_s27] sm:$0xf] }
 0x67f   : > { %v1566_v27 = vpop.f32.mrf.mxu1  ;;  %v1072_v38 = vunpack.c.l.bf16 %v1069_v26 }
 0x680   : > { %v1474_v27 = vcombine.low %v1069_v26, %v1069_v26 }
 0x681   : > { %v883_v28 = vpop.f32.mrf.mxu1 }
 0x682   : > { %v917_v29 = vsel %vm356_vm3, %v883_v28, -inf  ;;  %v916_v56 = vsub.f32 %v883_v28, %v906_v53 }
 0x683   : > { %918 = vmax.xlane.f32.xlu0 %v917_v29  ;;  %v1577_v30 = vpop.f32.mrf.mxu1 }
 0x685   : > { %v886_v31 = vpop.f32.mrf.mxu1 }
 0x687   : > { %v1578_v32 = vpop.f32.mrf.mxu1 }
 0x699   : > { %965 = vrot.lane.b32.xlu0 %v1661_v33, %s1716_s8 }
 0x69d   : > { %891 = vrot.lane.b32.xlu0 %v889_v37, %s1716_s8 }
 0x70c   : > { %v919_v40 = vpop.xlane.xlu0 %918 }
 0x70d   : > { %v920_v41 = vrot.slane %v919_v40, 4 }
 0x70f   : > { %v921_v42 = vmax.f32 %v919_v40, %v920_v41 }
 0x710   : > { %v966_v43 = vpop.permute.xlu0 %965 }
 0x711   : > { %v922_v44 = vrot.slane %v921_v42, 2  ;;  %v971_v45 = vsel %vm258_vm0, %v966_v43, 0 }
 0x712   : > { %1580 = vmatpush3.bf16.msra.mxu0 %v971_v45 }
 0x713   : > { %v923_v46 = vmax.f32 %v921_v42, %v922_v44  ;;  %1591 = vmatprep.subr.bf16.mxu0 %v1713_v1 }
 0x714   : > { %v892_v47 = vpop.permute.xlu0 %891 }
 0x715   : > { %v894_v48 = vsel %vm254_vm2, %v892_v47, 0.0  ;;  %v924_v49 = vrot.slane %v923_v46, 1 }
 0x716   : > { %895 = vadd.xlane.f32.xlu0 %v894_v48 }
 0x717   : > { %v925_v50 = vmax.f32 %v923_v46, %v924_v49  ;;  %v1664_v49 = vld [vmem:[%s1808_s30] ss:$0 sps:$4 sm:$0xff]  }
 0x719   : > { %1619 = vpush %v925_v50 }
 0x71a   : > { %909 = vmax.xlane.f32.xlu0 %v908_v51 }
 0x730   : > { %1181 = vrot.lane.b32.xlu0 %v1179_v57, %s1717_s10 }
 0x734   : > { %1077 = vrot.lane.b32.xlu0 %v1474_v27, %s1717_s10 }
 0x74a   : > { %s1620_s9 = spop %1619 }
 0x74b   : > { %v927_v58 = vstv %s1620_s9 }
 0x74c   : > { %v928_v59 = vsub.f32 %v916_v56, %v927_v58 }
 0x74e   : > { %v929_v60 = vmul.f32 1.442695, %v928_v59 }
 0x750   : > { %1673 = vpow2.f32 %v929_v60 }
 0x75d   : > { %v1674_v62 = vpop.eup %1673 }
 0x75e   : > { %v931_v63 = vadd.f32 0.0001, %v1674_v62 }
 0x760   : > { %v932_v0 = vmul.f32 0.25, %v931_v63 }
 0x762   : > { %v945_v3 = vpack.c.bf16 %v932_v0, %v932_v0  ;;  %v933_v7 = vsel %vm356_vm3, %v932_v0, 0.0 }
 0x763   : > { %v934_v11 = vrot.slane %v933_v7, 4 }
 0x764   : > { %946 = vxpose.xlu1.c.b16.start.end [1/1] (short) (narrow) %v945_v3, 16 }
 0x765   : > { %v935_v15 = vadd.f32 %v934_v11, %v933_v7 }
 0x767   : > { %v936_v16 = vrot.slane %v935_v15, 2 }
 0x768   : > { %1125 = vrot.lane.b32.xlu1 %v1476_v4, %s1717_s10 }
 0x769   : > { %v937_v17 = vadd.f32 %v936_v16, %v935_v15  ;;  %v660_v15 = vsel %vm356_vm3, %v1860_v10, 0.0 }
 0x76b   : > { %v938_v18 = vrot.slane %v937_v17, 1 }
 0x76d   : > { %v939_v22 = vadd.f32 %v938_v18, %v937_v17  ;;  %v390_v17 = vsel %vm356_vm3, %v1824_v61, 0.0 }
 0x79f   : > { %v896_v5 = vpop.xlane.xlu0 %895 }
 0x7a0   : > { %v897_v6 = vmul.f32 0.17677669, %v896_v5 }
 0x7a2   : > { %v907_v8 = vsub.f32 %v835_v35, %v897_v6 }
 0x7a3   : > { %v910_v9 = vpop.xlane.xlu0 %909 }
 0x7a4   : > { %v911_v13 = vsub.f32 %v907_v8, %v910_v9 }
 0x7a6   : > { %v912_v14 = vmul.f32 1.442695, %v911_v13 }
 0x7a7   : > { %v1182_v28 = vpop.permute.xlu0 %1181 }
 0x7a8   : > { %1675 = vpow2.f32 %v912_v14  ;;  %v1184_v29 = vsel %vm254_vm2, %v1182_v28, 0.0 }
 0x7a9   : > { %1185 = vadd.xlane.f32.xlu0 %v1184_v29 }
 0x7ab   : > { %v1078_v37 = vpop.permute.xlu0 %1077 }
 0x7b5   : > { %v1676_v19 = vpop.eup %1675 }
 0x7b6   : > { %v914_v20 = vadd.f32 0.0001, %v1676_v19 }
 0x7b8   : > { %v915_v21 = vmul.f32 0.25, %v914_v20 }
 0x7ba   : > { %v1891_v23 = vmul.f32 %v939_v22, %v915_v21  ;;  %v1014_v35 = vpack.c.bf16 %v915_v21, %v915_v21 }
 0x7bc   : > { %v941_v16 = vsel %vm356_vm3, %v1891_v23, 0.0 }
 0x7c6   : > { %v954_v25 = vpop.trf.xlu1 }
 0x7c7   : > { %1582 = vmatmul.mubr.msk.bf16.vlgmr.msra.gmra.mxu0 %vm254_vm2, %v954_v25 }
 0x7c8   : > { %1592 = vmatpush3.bf16.msra.mxu0 %v1769_v2  ;;  %1593 = vmatprep.mubr.msk.bf16.mxu0 %vm1714_vm1, %v1713_v1 }
 0x7c9   : > { %1603 = vmatprep.subr.bf16.mxu0 %v1713_v1 }
 0x7cf   : > { %1594 = vmatmul.mubr.msk.bf16.vlgmr.msra.gmra.mxu0 %vm254_vm2, %v1078_v37 }
 0x7d0   : > { %1605 = vmatprep.mubr.msk.bf16.mxu0 %vm1714_vm1, %v1713_v1 }
 0x7da   : > { %v1126_v36 = vpop.permute.xlu1 %1125 }
 0x832   : > { %v1186_v48 = vpop.xlane.xlu0 %1185 }
 0x833   : > { %v1187_v3 = vmul.f32 0.17677669, %v1186_v48 }
 0x887   : > { %v1007_v30 = vpop.f32.mrf.mxu0 }
 0x889   : > { %v1583_v31 = vpop.f32.mrf.mxu0 }
 0x88b   : > { %v1010_v32 = vpop.f32.mrf.mxu0 }
 0x88c   : > { %v1015_v33 = vpack.c.bf16 %v1010_v32, %v1007_v30 }
 0x88d   : > { %v1584_v34 = vpop.f32.mrf.mxu0 }
 0x88e   : > { %1586 = vmatpush3.bf16.msra.mxu1 %v1015_v33 }
 0x88f   : > { %1597 = vmatprep.subr.bf16.mxu1 %v1713_v1  ;;  %v1116_v51 = vpop.f32.mrf.mxu0 }
 0x890   : > { %v1189_v14 = vsel %vm356_vm3, %v1116_v51, -inf }
 0x891   : > { %1588 = vmatmul.mubr.msk.bf16.vlgmr.msra.gmra.mxu1 %vm356_vm3, %v1014_v35  ;;  %v1595_v52 = vpop.f32.mrf.mxu0 }
 0x892   : > { %1598 = vmatpush3.bf16.msra.mxu1 %v1769_v2  ;;  %1599 = vmatprep.mubr.msk.bf16.mxu1 %vm1714_vm1, %v1713_v1  ;;  %v1170_v2 = vmul.f32 %v1072_v38, %v1072_v38 }
 0x893   : > { %1609 = vmatprep.subr.bf16.mxu1 %v1713_v1  ;;  %v1119_v53 = vpop.f32.mrf.mxu0 }
 0x894   : > { %1172 = vrot.lane.b32.xlu0 %v1170_v2, %s1717_s10 }
 0x895   : > { %v1596_v54 = vpop.f32.mrf.mxu0 }
 0x899   : > { %1600 = vmatmul.mubr.msk.bf16.vlgmr.msra.gmra.mxu1 %vm254_vm2, %v1126_v36 }
 0x89a   : > { %1611 = vmatprep.mubr.msk.bf16.mxu1 %vm1714_vm1, %v1713_v1 }
 0x906   : > { %v1173_v50 = vpop.permute.xlu0 %1172 }
 0x907   : > { %v1175_v1 = vsel %vm254_vm2, %v1173_v50, 0.0 }
 0x908   : > { %1176 = vadd.xlane.f32.xlu0 %v1175_v1 }
 0x951   : > { %v1914_v39 = vpop.f32.mrf.mxu1 }
 0x953   : > { %v1589_v40 = vpop.f32.mrf.mxu1 }
 0x955   : > { %v1056_v41 = vpop.f32.mrf.mxu1 }
 0x957   : > { %v1590_v42 = vpop.f32.mrf.mxu1 }
 0x959   : > { %v1164_v43 = vpop.f32.mrf.mxu1 }
 0x95a   : > { %v1198_v44 = vsel %vm356_vm3, %v1164_v43, -inf  ;;  %v1197_v4 = vsub.f32 %v1164_v43, %v1187_v3 }
 0x95b   : > { %1199 = vmax.xlane.f32.xlu1 %v1198_v44  ;;  %v1601_v45 = vpop.f32.mrf.mxu1 }
 0x95d   : > { %v1167_v46 = vpop.f32.mrf.mxu1 }
 0x95f   : > { %v1602_v47 = vpop.f32.mrf.mxu1 }
 0x96c   : > { %1246 = vrot.lane.b32.xlu1 %v1664_v49, %s1717_s10 }
 0x991   : > { %v1177_v19 = vpop.xlane.xlu0 %1176 }
 0x992   : > { %v1178_v20 = vmul.f32 0.17677669, %v1177_v19 }
 0x994   : > { %v1188_v22 = vsub.f32 %v1116_v51, %v1178_v20 }
 0x9e4   : > { %v1200_v55 = vpop.xlane.xlu1 %1199 }
 0x9e5   : > { %v1201_v56 = vrot.slane %v1200_v55, 4 }
 0x9e7   : > { %v1202_v57 = vmax.f32 %v1200_v55, %v1201_v56 }
 0x9e8   : > { %v1247_v58 = vpop.permute.xlu1 %1246 }
 0x9e9   : > { %v1203_v59 = vrot.slane %v1202_v57, 2  ;;  %v1252_v60 = vsel %vm258_vm0, %v1247_v58, 0 }
 0x9ea   : > { %1604 = vmatpush3.bf16.msra.mxu0 %v1252_v60 }
 0x9eb   : > { %v1204_v62 = vmax.f32 %v1202_v57, %v1203_v59 }
 0x9ed   : > { %v1205_v63 = vrot.slane %v1204_v62, 1 }
 0x9ef   : > { %v1206_v0 = vmax.f32 %v1204_v62, %v1205_v63 }
 0x9f1   : > { %1621 = vpush %v1206_v0 }
 0xa22   : > { %s1622_s11 = spop %1621 }
 0xa23   : > { %v1208_v5 = vstv %s1622_s11 }
 0xa24   : > { %v1209_v6 = vsub.f32 %v1197_v4, %v1208_v5 }
 0xa26   : > { %v1210_v7 = vmul.f32 1.442695, %v1209_v6 }
 0xa28   : > { %1677 = vpow2.f32 %v1210_v7 }
 0xa35   : > { %v1678_v8 = vpop.eup %1677 }
 0xa36   : > { %v1212_v9 = vadd.f32 0.0001, %v1678_v8 }
 0xa38   : > { %v1213_v11 = vmul.f32 0.25, %v1212_v9 }
 0xa3a   : > { %v1226_v13 = vpack.c.bf16 %v1213_v11, %v1213_v11  ;;  %v1214_v21 = vsel %vm356_vm3, %v1213_v11, 0.0 }
 0xa3b   : > { %v1215_v26 = vrot.slane %v1214_v21, 4 }
 0xa3c   : > { %1227 = vxpose.xlu1.c.b16.start.end [1/1] (short) (narrow) %v1226_v13, 16 }
 0xa3d   : > { %v1216_v23 = vadd.f32 %v1215_v26, %v1214_v21 }
 0xa3f   : > { %v1217_v30 = vrot.slane %v1216_v23, 2 }
 0xa41   : > { %v1218_v31 = vadd.f32 %v1217_v30, %v1216_v23 }
 0xa43   : > { %v1219_v32 = vrot.slane %v1218_v31, 1 }
 0xa45   : > { %v1220_v36 = vadd.f32 %v1219_v32, %v1218_v31 }
 0xa49   : > { %1190 = vmax.xlane.f32.xlu1 %v1189_v14 }
 0xa4d   : > { %661 = vadd.xlane.f32.xlu1 %v660_v15 }
 0xa51   : > { %942 = vadd.xlane.f32.xlu1 %v941_v16 }
 0xa55   : > { %391 = vadd.xlane.f32.xlu1 %v390_v17 }
 0xa9e   : > { %v1235_v18 = vpop.trf.xlu1 }
 0xa9f   : > { %1606 = vmatmul.mubr.msk.bf16.vlgmr.msra.gmra.mxu0 %vm254_vm2, %v1235_v18 }
 0xad2   : > { %v1191_v25 = vpop.xlane.xlu1 %1190 }
 0xad3   : > { %v1192_v10 = vsub.f32 %v1188_v22, %v1191_v25 }
 0xad5   : > { %v1193_v27 = vmul.f32 1.442695, %v1192_v10 }
 0xad6   : > { %v662_v28 = vpop.xlane.xlu1 %661 }
 0xad7   : > { %1679 = vpow2.f32 %v1193_v27 }
 0xada   : > { %v943_v29 = vpop.xlane.xlu1 %942 }
 0xadb   : > { %1681 = vrcp.f32 %v943_v29 }
 0xade   : > { %v392_v61 = vpop.xlane.xlu1 %391 }
 0xadf   : > { %1683 = vrcp.f32 %v392_v61 }
 0xae0   : > { %1685 = vrcp.f32 %v662_v28 }
 0xae4   : > { %v1680_v33 = vpop.eup %1679 }
 0xae5   : > { %v1195_v34 = vadd.f32 0.0001, %v1680_v33 }
 0xae7   : > { %v1196_v35 = vmul.f32 0.25, %v1195_v34 }
 0xae8   : > { %v1682_v37 = vpop.eup %1681 }
 0xae9   : > { %v1221_v38 = vmul.f32 %v1220_v36, %v1196_v35  ;;  %v1059_v2 = vmul.f32 %v1682_v37, %v1914_v39  ;;  %v1295_v1 = vpack.c.bf16 %v1196_v35, %v1196_v35 }
 0xaeb   : > { %v1222_v40 = vsel %vm356_vm3, %v1221_v38, 0.0  ;;  %v1485_v41 = vpack.c.bf16 %v1059_v2, %v1059_v2 }
 0xaec   : > { %v1684_v42 = vpop.eup %1683  ;;  %1223 = vadd.xlane.f32.xlu0 %v1222_v40 }
 0xaed   : > { %1064 = vrot.lane.b32.xlu1 %v1485_v41, %s1718_s12  ;;  %v503_v43 = vmul.f32 %v1684_v42, %v1841_v12  ;;  %v1686_v39 = vpop.eup %1685 }
 0xaee   : > { %v778_v45 = vmul.f32 %v1686_v39, %v1877_v24 }
 0xaef   : > { %v504_v44 = vpack.c.bf16 %v503_v43, %v503_v43 }
 0xaf0   : > { %v1484_v46 = vpack.c.bf16 %v778_v45, %v778_v45 }
 0xaf1   : > { %506 = vst.msk [vmem:[%s1937_s15] sm:$0xf] %vm505_vm4, %v504_v44 }
 0xb02   : > { %783 = vrot.lane.b32.xlu0 %v1484_v46, %s1719_s19 }
 0xb5f   : > { %v1288_v47 = vpop.f32.mrf.mxu0  ;;  %v1065_v24 = vpop.permute.xlu1 %1064 }
 0xb61   : > { %v1607_v48 = vpop.f32.mrf.mxu0 }
 0xb63   : > { %v1291_v12 = vpop.f32.mrf.mxu0 }
 0xb64   : > { %v1296_v49 = vpack.c.bf16 %v1291_v12, %v1288_v47 }
 0xb65   : > { %v1608_v50 = vpop.f32.mrf.mxu0 }
 0xb66   : > { %1610 = vmatpush3.bf16.msra.mxu1 %v1296_v49 }
 0xb69   : > { %1612 = vmatmul.mubr.msk.bf16.vlgmr.msra.gmra.mxu1 %vm356_vm3, %v1295_v1 }
 0xb75   : > { %v1224_v51 = vpop.xlane.xlu0 %1223 }
 0xb76   : > { %1687 = vrcp.f32 %v1224_v51 }
 0xb79   : > { %v784_v52 = vpop.permute.xlu0 %783 }
 0xb7a   : > { %787 = vst.msk [vmem:[%s1937_s15] sm:$0xf] %vm786_vm5, %v784_v52 }
 0xb7b   : > { %1068 = vst.msk [vmem:[%s1937_s15] sm:$0xf] %vm1067_vm6, %v1065_v24 }
 0xb83   : > { %v1688_v53 = vpop.eup %1687 }
 0xc29   : > { %v1334_v54 = vpop.f32.mrf.mxu1 }
 0xc2a   : > { %v1340_v55 = vmul.f32 %v1688_v53, %v1334_v54 }
 0xc2b   : > { %v1613_v56 = vpop.f32.mrf.mxu1 }
 0xc2c   : > { %v1486_v57 = vpack.c.bf16 %v1340_v55, %v1340_v55 }
 0xc2d   : > { %v1337_v58 = vpop.f32.mrf.mxu1 }
 0xc2e   : > { %1345 = vrot.lane.b32.xlu1 %v1486_v57, %s1720_s20 }
 0xc2f   : > { %v1614_v59 = vpop.f32.mrf.mxu1 }
 0xca0   : > { %v1346_v60 = vpop.permute.xlu1 %1345 }
 0xca1   : > { %1349 = vst.msk [vmem:[%s1937_s15] sm:$0xf] %vm1348_vm7, %v1346_v60 }
 0xca2 PF: > { %s14_s17 = sadd.s32 1, %s1711_s17   ;;  %s1959_s15 = smov %s1707_s16 }
 0xca3   : > { %p11_p5 = scmp.ge.s32.totalorder %s14_s17, 4   ;;  %s1960_s16 = smov %s1962_s18 }
 0xca5   :  { %13 = sbr.rel (!%p11_p5) target bundleno = 2 (0x2), region = 72 }

// kernel: performer_forward.14
= control target key start
LH: loop header
LB: loop body
LE: loop exit
PB: predicated region body
PF: predicated region fallthrough
CT: control target
= control target key end

     0   :  { %v151_v0 = vmov 0.0   ;;  %vm152_vm0 = vmmov 0   ;;  %vm64_vm1 = vcmask 523264   ;;  %vm113_vm2 = vcmask 261120   ;;  %s208_s1 = inlined_call_operand.vmem [shape: bf16[64,32], index: 1, kind: input, shape index: {}]   ;;  %s209_s0 = inlined_call_operand.vmem [shape: bf16[16,64], index: 0, kind: input, shape index: {}]   ;;  %s210_s2 = inlined_call_operand.vmem [shape: f32[1,32], index: 2, kind: input, shape index: {}]   ;;  %s211_s3 = inlined_call_operand.vmem [shape: f32[16,32], index: 3, kind: input, shape index: {}]   ;;  %s212_s4 = inlined_call_operand.vmem [shape: f32[16,32], index: 4, kind: output, shape index: {}]  }
   0x1   :  { %132 = vmatprep.subr.bf16.mxu0 %v151_v0  ;;  %v146_v1 = vld [vmem:[%s208_s1 + $0x18] sm:$0xff]   ;;  %140 = vmatprep.mubr.msk.bf16.mxu0 %vm152_vm0, %v151_v0  ;;  %v147_v2 = vld [vmem:[%s208_s1 + $0x10] sm:$0xff]   ;;  %v148_v3 = vld [vmem:[%s208_s1 + $0x8] sm:$0xff]  }
   0x2   :  { %133 = vmatpush3.bf16.msra.mxu0 %v146_v1  ;;  %v149_v4 = vld [vmem:[%s208_s1] sm:$0xff]   ;;  %v110_v13 = vld [vmem:[%s211_s3 + $0x8] sm:$0xff] }
   0x3   :  { %134 = vmatprep.subr.bf16.mxu0 %v151_v0  ;;  %v150_v5 = vld [vmem:[%s209_s0] sm:$0xff]  }
   0x4   :  { %v120_v6 = vld [vmem:[%s210_s2] ss:$0 sm:$0xff] }
   0x5   :  { %v109_v8 = vld [vmem:[%s211_s3] sm:$0xff] }
   0x6   :  { %135 = vmatpush3.bf16.msra.mxu0 %v147_v2 }
   0x7   :  { %136 = vmatprep.subr.bf16.mxu0 %v151_v0 }
   0xa   :  { %137 = vmatpush3.bf16.msra.mxu0 %v148_v3 }
   0xb   :  { %138 = vmatprep.subr.bf16.mxu0 %v151_v0 }
   0xe   :  { %139 = vmatpush3.bf16.msra.mxu0 %v149_v4 }
  0x11   :  { %141 = vmatmul.mubr.msk.bf16.vlgmr.msra.gmra.mxu0 %vm64_vm1, %v150_v5 }
  0xd1   :  { %v102_v7 = vpop.f32.mrf.mxu0 }
  0xd2   :  { %v103_v9 = vadd.f32 %v120_v6, %v102_v7 }
  0xd3   :  { %v142_v10 = vpop.f32.mrf.mxu0 }
  0xd4   :  { %v111_v11 = vadd.f32 %v109_v8, %v103_v9 }
  0xd5   :  { %v105_v12 = vpop.f32.mrf.mxu0 }
  0xd6   :  { %114 = vst.msk [vmem:[%s212_s4] sm:$0xff] %vm113_vm2, %v111_v11  ;;  %v106_v14 = vadd.f32 %v120_v6, %v105_v12 }
  0xd7   :  { %v143_v15 = vpop.f32.mrf.mxu0 }
  0xd8   :  { %v112_v16 = vadd.f32 %v110_v13, %v106_v14 }
  0xda   :  { %115 = vst.msk [vmem:[%s212_s4 + $0x8] sm:$0xff] %vm113_vm2, %v112_v16 }

// kernel: performer_forward.15
= control target key start
LH: loop header
LB: loop body
LE: loop exit
PB: predicated region body
PF: predicated region fallthrough
CT: control target
= control target key end

     0   :  { %vm25_vm0 = vcmask 261120   ;;  %v181_v14 = vmov 0.0   ;;  %vm182_vm1 = vmmov 0   ;;  %vm145_vm2 = vcmask 781312   ;;  %s245_s0 = inlined_call_operand.vmem [shape: f32[16,32], index: 0, kind: input, shape index: {}]   ;;  %s246_s3 = inlined_call_operand.vmem [shape: bf16[32,96], index: 3, kind: input, shape index: {}]   ;;  %s247_s1 = inlined_call_operand.vmem [shape: f32[1,32], index: 1, kind: input, shape index: {}]   ;;  %s248_s2 = inlined_call_operand.vmem [shape: f32[1,32], index: 2, kind: input, shape index: {}]   ;;  %s249_s4 = inlined_call_operand.vmem [shape: f32[1,96], index: 4, kind: input, shape index: {}]   ;;  %s250_s5 = inlined_call_operand.vmem [shape: bf16[16,96], index: 5, kind: output, shape index: {}]  }
   0x1   :  { %v21_v0 = vld [vmem:[%s245_s0] sm:$0xff]  ;;  %v22_v1 = vld [vmem:[%s245_s0 + $0x8] sm:$0xff]  ;;  %165 = vmatprep.subr.bf16.mxu0 %v181_v14  ;;  %169 = vmatprep.mubr.msk.bf16.mxu0 %vm182_vm1, %v181_v14 }
   0x2   :  { %v26_v2 = vsel %vm25_vm0, %v21_v0, 0.0  ;;  %v29_v3 = vsel %vm25_vm0, %v22_v1, 0.0  ;;  %v175_v15 = vld [vmem:[%s246_s3 + $0x8] sm:$0xff]   ;;  %v176_v16 = vld [vmem:[%s246_s3] sm:$0xff]  }
   0x3   :  { %27 = vadd.xlane.f32.xlu0 %v26_v2  ;;  %166 = vmatpush3.bf16.msra.mxu0 %v175_v15  ;;  %v152_v25 = vld [vmem:[%s247_s1] ss:$0 sm:$0xff] }
   0x4   :  { %167 = vmatprep.subr.bf16.mxu0 %v181_v14  ;;  %v153_v29 = vld [vmem:[%s248_s2] ss:$0 sm:$0xff] }
   0x5   :  { %v154_v34 = vld [vmem:[%s249_s4] ss:$0 sm:$0xff] }
   0x7   :  { %30 = vadd.xlane.f32.xlu0 %v29_v3  ;;  %168 = vmatpush3.bf16.msra.mxu0 %v176_v16 }
  0x8c   :  { %v28_v4 = vpop.xlane.xlu0 %27 }
  0x8d   :  { %v33_v5 = vmul.f32 0.03125, %v28_v4 }
  0x8f   :  { %v35_v6 = vsub.f32 %v21_v0, %v33_v5 }
  0x90   :  { %v31_v7 = vpop.xlane.xlu0 %30 }
  0x91   :  { %v34_v8 = vmul.f32 0.03125, %v31_v7  ;;  %v37_v9 = vmul.f32 %v35_v6, %v35_v6 }
  0x93   :  { %v36_v10 = vsub.f32 %v22_v1, %v34_v8  ;;  %v39_v11 = vsel %vm25_vm0, %v37_v9, 0.0 }
  0x94   :  { %40 = vadd.xlane.f32.xlu1 %v39_v11 }
  0x95   :  { %v38_v12 = vmul.f32 %v36_v10, %v36_v10 }
  0x97   :  { %v42_v13 = vsel %vm25_vm0, %v38_v12, 0.0 }
  0x98   :  { %43 = vadd.xlane.f32.xlu1 %v42_v13 }
 0x11d   :  { %v41_v17 = vpop.xlane.xlu1 %40 }
 0x11e   :  { %v45_v18 = vmul.f32 0.03125, %v41_v17 }
 0x120   :  { %v47_v19 = vadd.f32 1e-05, %v45_v18 }
 0x121   :  { %v44_v20 = vpop.xlane.xlu1 %43 }
 0x122   :  { %177 = vrsqrt.f32 %v47_v19  ;;  %v46_v21 = vmul.f32 0.03125, %v44_v20 }
 0x124   :  { %v48_v22 = vadd.f32 1e-05, %v46_v21 }
 0x126   :  { %179 = vrsqrt.f32 %v48_v22 }
 0x12f   :  { %v178_v23 = vpop.eup %177 }
 0x130   :  { %v51_v24 = vmul.f32 %v178_v23, %v35_v6 }
 0x132   :  { %v59_v28 = vmul.f32 %v152_v25, %v51_v24 }
 0x133   :  { %v180_v26 = vpop.eup %179 }
 0x134   :  { %v52_v27 = vmul.f32 %v180_v26, %v36_v10  ;;  %v67_v31 = vadd.f32 %v153_v29, %v59_v28 }
 0x136   :  { %v60_v30 = vmul.f32 %v152_v25, %v52_v27 }
 0x138   :  { %v68_v32 = vadd.f32 %v153_v29, %v60_v30 }
 0x13a   :  { %v69_v33 = vpack.c.bf16 %v68_v32, %v67_v31 }
 0x13c   :  { %170 = vmatmul.mubr.msk.bf16.vlgmr.msra.gmra.mxu0 %vm25_vm0, %v69_v33 }
 0x1fc   :  { %v130_v35 = vpop.f32.mrf.mxu0 }
 0x1fd   :  { %v131_v36 = vadd.f32 %v154_v34, %v130_v35 }
 0x1fe   :  { %v171_v37 = vpop.f32.mrf.mxu0 }
 0x1ff   :  { %v160_v38 = vpack.c.bf16 %v131_v36, %v131_v36 }
 0x200   :  { %v133_v39 = vpop.f32.mrf.mxu0 }
 0x201   :  { %146 = vst.msk [vmem:[%s250_s5] sm:$0xf] %vm145_vm2, %v160_v38  ;;  %v134_v40 = vadd.f32 %v154_v34, %v133_v39 }
 0x202   :  { %v172_v41 = vpop.f32.mrf.mxu0 }
 0x203   :  { %v161_v42 = vpack.c.bf16 %v134_v40, %v134_v40 }
 0x205   :  { %147 = vst.msk [vmem:[%s250_s5 + $0x4] sm:$0xf] %vm145_vm2, %v161_v42 }

// kernel: performer_forward.19
= control target key start
LH: loop header
LB: loop body
LE: loop exit
PB: predicated region body
PF: predicated region fallthrough
CT: control target
= control target key end

     0   :  { %v189_v1 = vmov 0.0   ;;  %vm190_vm0 = vmmov 0   ;;  %s246_s0 = inlined_call_operand.vmem [shape: bf16[16,64], index: 0, kind: input, shape index: {}]   ;;  %s247_s1 = inlined_call_operand.vmem [shape: bf16[64,32], index: 1, kind: input, shape index: {}]   ;;  %s248_s2 = inlined_call_operand.vmem [shape: f32[1,32], index: 2, kind: input, shape index: {}]   ;;  %s249_s3 = inlined_call_operand.vmem [shape: f32[16,32], index: 3, kind: input, shape index: {}]   ;;  %s250_s4 = inlined_call_operand.hbm [shape: f32[16,32], index: 4, kind: output, shape index: {}]  }
   0x1   :  { %v162_v0 = vld [vmem:[%s247_s1 + $0x18] sm:$0xff]   ;;  %145 = vmatprep.subr.bf16.mxu0 %v189_v1  ;;  %v163_v2 = vld [vmem:[%s247_s1 + $0x10] sm:$0xff]   ;;  %153 = vmatprep.mubr.msk.bf16.mxu0 %vm190_vm0, %v189_v1 }
   0x2   :  { %146 = vmatpush3.bf16.msra.mxu0 %v162_v0 }
   0x3   :  { %147 = vmatprep.subr.bf16.mxu0 %v189_v1 }
   0x4   :  { %9 = vsyncpa [#allocation3], 0  ;;  %v164_v3 = vld [vmem:[%s247_s1 + $0x8] sm:$0xff]   ;;  %v165_v4 = vld [vmem:[%s247_s1] sm:$0xff]   ;;  %vm65_vm1 = vcmask 523264   ;;  %vm114_vm2 = vcmask 261120  }
   0x5   :  { %v166_v5 = vld [vmem:[%s246_s0] sm:$0xff]   ;;  %s191_s1 = smov [#allocation2]   ;;  %v111_v13 = vld [vmem:[%s249_s3 + $0x8] sm:$0xff] }
   0x6   :  { %148 = vmatpush3.bf16.msra.mxu0 %v163_v2  ;;  %v133_v6 = vld [vmem:[%s248_s2] ss:$0 sm:$0xff]  ;;  %s122_s29 = sshll.u32 %s191_s1, 4  ;;  %s123_s29 = int_to_ptr.vmem [resolvable:$true] %s122_s29 }
   0x7   :  { %149 = vmatprep.subr.bf16.mxu0 %v189_v1  ;;  %v110_v8 = vld [vmem:[%s249_s3] sm:$0xff]  ;;  %s167_s2 = scalar_lea.vmem %s123_s29, 256  ;;  %p172_p1 = scmp.lt.s32.totalorder %s123_s29, %s123_s29 }
   0x8   :  { %p168_p0 = scmp.ne.s32.totalorder %s123_s29, %s167_s2  ;;  %p173_p2 = scmp.lt.s32.totalorder %s167_s2, %s167_s2 }
   0xa   :  { %150 = vmatpush3.bf16.msra.mxu0 %v164_v3  ;;  %p174_p3 = por %p173_p2, %p172_p1 }
   0xb   :  { %151 = vmatprep.subr.bf16.mxu0 %v189_v1 }
   0xc   :  { %p175_p4 = pnand %p174_p3, %p168_p0 }
   0xe   :  { %152 = vmatpush3.bf16.msra.mxu0 %v165_v4 }
  0x11   :  { %154 = vmatmul.mubr.msk.bf16.vlgmr.msra.gmra.mxu0 %vm65_vm1, %v166_v5 }
  0xd1   :  { %v103_v7 = vpop.f32.mrf.mxu0 }
  0xd2   :  { %v104_v9 = vadd.f32 %v133_v6, %v103_v7 }
  0xd3   :  { %v155_v10 = vpop.f32.mrf.mxu0 }
  0xd4   :  { %v112_v11 = vadd.f32 %v110_v8, %v104_v9 }
  0xd5   :  { %v106_v12 = vpop.f32.mrf.mxu0 }
  0xd6   :  { %115 = vst.msk [vmem:[#allocation2] sm:$0xff] %vm114_vm2, %v112_v11  ;;  %v107_v14 = vadd.f32 %v133_v6, %v106_v12 }
  0xd7   :  { %v156_v15 = vpop.f32.mrf.mxu0 }
  0xd8   :  { %v113_v16 = vadd.f32 %v111_v13, %v107_v14 }
  0xda   :  { %116 = vst.msk [vmem:[#allocation2 + $0x8] sm:$0xff] %vm114_vm2, %v113_v16 }
  0xdb   :  { %178 = shalt.err (!%p175_p4)
}
  0xdc   :  { %s192_s5 = smov 128   ;;  %s193_s6 = smov 8  }
  0xdd   :  { %128 = dma.vmem_to_hbm [thread:$0]  %s123_s29, 256, %s250_s4, [#allocation3], %s192_s5, %s192_s5, %s193_s6  }
  0xde   :  { %187 = dma.done.wait [#allocation3], 256  }
  0xdf   :  { %188 = vsyncadd [#allocation3], 4294967040 }
  0xe0   :  { %132 = vsyncpa [#allocation3], 1 }

</bundles_post_ra>
